<compile_context>
chip_gen: v6e
topology: v6e:2x2x1
jax: 0.10.0
libtpu: 0.0.40
codegen_flags: <defaults>
</compile_context>

<pallas_src>
import functools

import jax
import jax.numpy as jnp
from jax import lax
from jax.experimental import pallas as pl
from jax.experimental.pallas import tpu as pltpu


def _sdpa_kernel(q_ref, k_ref, v_ref, mask_ref, out_ref, attn_ref,
                 m_ref, l_ref, acc_ref, *, inv_temper, tk_tile):
    ki = pl.program_id(2)
    nk = pl.num_programs(2)

    @pl.when(ki == 0)
    def _init():
        m_ref[...] = jnp.full_like(m_ref, -jnp.inf)
        l_ref[...] = jnp.zeros_like(l_ref)
        acc_ref[...] = jnp.zeros_like(acc_ref)
        attn_ref[...] = jnp.zeros_like(attn_ref)

    # Fold the 1/sqrt(d_model) scale into the small (TQ, D) q tile instead of
    # scaling the (TQ, TK) score matrix.
    q = q_ref[0] * jnp.asarray(inv_temper, dtype=q_ref.dtype)      # (TQ, D)
    k = k_ref[0]                                                   # (TK, D)
    v = v_ref[0]                                                   # (TK, Dv)

    # scores = q @ k^T via dot_general contracting last dims (no explicit .T).
    s = lax.dot_general(q, k, (((1,), (1,)), ((), ())),
                        preferred_element_type=jnp.float32)        # (TQ, TK)

    # masked_fill(mask, -1e18); mask is int8, nonzero => masked.
    s = jnp.where(mask_ref[0] != 0, jnp.float32(-1e18), s)

    # Online softmax update (all stats in f32).
    m_prev = m_ref[...]                                            # (TQ, 1)
    m_new = jnp.maximum(m_prev, jnp.max(s, axis=-1, keepdims=True))
    alpha = jnp.exp(m_prev - m_new)                                # (TQ, 1)
    p = jnp.exp(s - m_new)                                         # (TQ, TK)

    l_ref[...] = alpha * l_ref[...] + jnp.sum(p, axis=-1, keepdims=True)
    # PV matmul with probs cast to V's dtype (bf16 when inputs are bf16),
    # f32 accumulation.
    acc_ref[...] = alpha * acc_ref[...] + jnp.dot(
        p.astype(v_ref.dtype), v, preferred_element_type=jnp.float32)
    m_ref[...] = m_new

    # Keep the full-key-width attention slab consistent with the running max
    # (rescale previously written columns), then drop in the new tile.
    @pl.when(ki > 0)
    def _rescale():
        attn_ref[0] = (attn_ref[0] * alpha).astype(attn_ref.dtype)

    col = pl.multiple_of(ki * tk_tile, tk_tile)
    attn_ref[0, :, pl.ds(col, tk_tile)] = p.astype(attn_ref.dtype)

    @pl.when(ki == nk - 1)
    def _finalize():
        # EUP reciprocal + one Newton step: keeps the divide off the VALU while
        # staying numerically tight (error ~ eps^2) for the exact attn output.
        l = l_ref[...]
        inv_l = pl.reciprocal(l, approx=True)
        inv_l = inv_l * (2.0 - l * inv_l)
        out_ref[0] = (acc_ref[...] * inv_l).astype(out_ref.dtype)
        attn_ref[0] = (attn_ref[0] * inv_l).astype(attn_ref.dtype)


def _pick_tile(dim, target):
    # Use the target tile if it divides the dim, otherwise fall back to the
    # full dimension (BlockSpec requires divisibility or full-extent blocks).
    # TODO(synk): pad ragged Tq/Tk to a tile multiple instead of falling back.
    if dim <= target or dim % target != 0:
        return dim
    return target


def scaled_dot_product_attention(q, k, v, attn_mask=None, *, d_model=None,
                                 tq_tile=128, tk_tile=512):
    """Pallas implementation of ScaledDotProductAttention.forward (eval mode)."""
    B, Tq, D = q.shape
    Bk, Tk, Dk = k.shape
    Bv, Tkv, Dv = v.shape
    assert (Bk, Dk) == (B, D) and (Bv, Tkv) == (B, Tk)
    if d_model is None:
        d_model = D
    inv_temper = 1.0 / (float(d_model) ** 0.5)

    if attn_mask is None:
        # TODO(synk): add a maskless kernel variant to skip the mask DMA entirely.
        mask = jnp.zeros((B, Tq, Tk), dtype=jnp.int8)
    else:
        assert attn_mask.shape == (B, Tq, Tk), (
            f"Attention mask shape {attn_mask.shape} mismatch with "
            f"Attention logit tensor shape {(B, Tq, Tk)}.")
        mask = (attn_mask != 0).astype(jnp.int8)   # int8: 4x less HBM than f32

    TQ = _pick_tile(Tq, tq_tile)
    TK = _pick_tile(Tk, tk_tile)
    grid = (B, Tq // TQ, Tk // TK)

    attn_dtype = q.dtype
    kernel = functools.partial(_sdpa_kernel, inv_temper=inv_temper, tk_tile=TK)

    grid_spec = pltpu.PrefetchScalarGridSpec(
        num_scalar_prefetch=0,
        grid=grid,
        in_specs=[
            pl.BlockSpec((1, TQ, D), lambda b, qi, ki: (b, qi, 0)),
            pl.BlockSpec((1, TK, D), lambda b, qi, ki: (b, ki, 0)),
            pl.BlockSpec((1, TK, Dv), lambda b, qi, ki: (b, ki, 0)),
            pl.BlockSpec((1, TQ, TK), lambda b, qi, ki: (b, qi, ki)),
        ],
        out_specs=[
            # Both outputs stay resident across the Tk (reduction) axis.
            pl.BlockSpec((1, TQ, Dv), lambda b, qi, ki: (b, qi, 0)),
            pl.BlockSpec((1, TQ, Tk), lambda b, qi, ki: (b, qi, 0)),
        ],
        scratch_shapes=[
            pltpu.VMEM((TQ, 1), jnp.float32),    # running max m
            pltpu.VMEM((TQ, 1), jnp.float32),    # running denom l
            pltpu.VMEM((TQ, Dv), jnp.float32),   # output accumulator
        ],
    )

    itemsize = jnp.dtype(q.dtype).itemsize
    bytes_accessed = int(
        q.size * itemsize + k.size * jnp.dtype(k.dtype).itemsize
        + v.size * jnp.dtype(v.dtype).itemsize + mask.size
        + B * Tq * Dv * itemsize
        + B * Tq * Tk * jnp.dtype(attn_dtype).itemsize)
    cost = pl.CostEstimate(
        flops=2 * B * Tq * Tk * (D + Dv),
        transcendentals=B * Tq * Tk,
        bytes_accessed=bytes_accessed,
    )

    out, attn = pl.pallas_call(
        kernel,
        out_shape=(
            jax.ShapeDtypeStruct((B, Tq, Dv), q.dtype),
            jax.ShapeDtypeStruct((B, Tq, Tk), attn_dtype),
        ),
        grid_spec=grid_spec,
        compiler_params=pltpu.CompilerParams(
            # B and Tq tiles shard across TensorCores (v7x megacore); Tk is the
            # sequential reduction axis.
            dimension_semantics=("parallel", "parallel", "arbitrary"),
            # Explicit scoped-VMEM ceiling; stays under v7x's 64 MiB physical.
            vmem_limit_bytes=48 * 1024 * 1024,
        ),
        cost_estimate=cost,
    )(q, k, v, mask)
    return out, attn


def _reference(q, k, v, attn_mask, d_model):
    temper = float(d_model) ** 0.5
    scores = jnp.einsum("bqd,bkd->bqk", q, k) / temper
    scores = jnp.where(attn_mask != 0, -1e18, scores)
    attn = jax.nn.softmax(scores, axis=-1)
    out = jnp.einsum("bqk,bkd->bqd", attn, v)
    return out, attn


if __name__ == "__main__":
    # Small but lane-dense shapes; tile sizes chosen so the Tq and Tk tiling
    # (grid = (2, 2, 2)) and the online-softmax path are actually exercised.
    B, Tq, Tk, D, Dv = 2, 256, 256, 128, 128
    d_model = D

    key = jax.random.PRNGKey(0)
    kq, kk, kv, km = jax.random.split(key, 4)
    q = jax.random.normal(kq, (B, Tq, D), dtype=jnp.float32)
    k = jax.random.normal(kk, (B, Tk, D), dtype=jnp.float32)
    v = jax.random.normal(kv, (B, Tk, Dv), dtype=jnp.float32)
    # Deterministic 0/1 float mask, never masking a full row.
    attn_mask = (jax.random.uniform(km, (B, Tq, Tk)) > 0.7).astype(jnp.float32)
    attn_mask = attn_mask.at[:, :, 0].set(0.0)

    out, attn = scaled_dot_product_attention(
        q, k, v, attn_mask, d_model=d_model, tq_tile=128, tk_tile=128)
    out, attn = jax.block_until_ready((out, attn))

    ref_out, ref_attn = _reference(q, k, v, attn_mask, d_model)
    assert jnp.allclose(out, ref_out, atol=1e-3, rtol=1e-3), (
        float(jnp.max(jnp.abs(out - ref_out))))
    assert jnp.allclose(attn, ref_attn, atol=1e-3, rtol=1e-3), (
        float(jnp.max(jnp.abs(attn - ref_attn))))

    print("KERNEL_OK")
</pallas_src>

<mosaic_0001>
module attributes {stable_mosaic.version = 11 : i64} {
  func.func @_sdpa_kernel(%arg0: i32, %arg1: i32, %arg2: i32, %arg3: memref<1x128x128xf32, #tpu.memory_space<vmem>>, %arg4: memref<1x128x128xf32, #tpu.memory_space<vmem>>, %arg5: memref<1x128x128xf32, #tpu.memory_space<vmem>>, %arg6: memref<1x128x128xi8, #tpu.memory_space<vmem>>, %arg7: memref<1x128x128xf32, #tpu.memory_space<vmem>>, %arg8: memref<1x128x256xf32, #tpu.memory_space<vmem>>, %arg9: memref<128x1xf32, #tpu.memory_space<vmem>>, %arg10: memref<128x1xf32, #tpu.memory_space<vmem>>, %arg11: memref<128x128xf32, #tpu.memory_space<vmem>>) attributes {dimension_semantics = [#tpu.dimension_semantics<parallel>, #tpu.dimension_semantics<parallel>, #tpu.dimension_semantics<arbitrary>], iteration_bounds = array<i64: 2, 2, 2>, scalar_prefetch = 0 : i64, scratch_operands = 3 : i64, tpu.core_type = #tpu.core_type<tc>, window_params = [{transform_indices = @transform_0, window_bounds = array<i64: 1, 128, 128>}, {transform_indices = @transform_1, window_bounds = array<i64: 1, 128, 128>}, {transform_indices = @transform_2, window_bounds = array<i64: 1, 128, 128>}, {transform_indices = @transform_3, window_bounds = array<i64: 1, 128, 128>}, {transform_indices = @transform_4, window_bounds = array<i64: 1, 128, 128>}, {transform_indices = @transform_5, window_bounds = array<i64: 1, 128, 256>}]} {
    %c0_i32 = arith.constant 0 : i32
    %0 = arith.cmpi eq, %arg2, %c0_i32 : i32
    %1 = arith.extui %0 : i1 to i32
    %c0_i32_0 = arith.constant 0 : i32
    %2 = arith.cmpi ne, %1, %c0_i32_0 : i32
    scf.if %2 {
      %cst_34 = arith.constant 0xFF800000 : f32
      %52 = vector.broadcast %cst_34 : f32 to vector<128x1xf32>
      %c0_35 = arith.constant 0 : index
      %c0_36 = arith.constant 0 : index
      %53 = vector.load %arg9[%c0_35, %c0_36] : memref<128x1xf32, #tpu.memory_space<vmem>>, vector<128x1xf32>
      tpu.vector_store %arg9[%c0_35, %c0_36], %52 {strides = array<i32>} : memref<128x1xf32, #tpu.memory_space<vmem>>, vector<128x1xf32>,
      %cst_37 = arith.constant 0.000000e+00 : f32
      %54 = vector.broadcast %cst_37 : f32 to vector<128x1xf32>
      %c0_38 = arith.constant 0 : index
      %c0_39 = arith.constant 0 : index
      %55 = vector.load %arg10[%c0_38, %c0_39] : memref<128x1xf32, #tpu.memory_space<vmem>>, vector<128x1xf32>
      tpu.vector_store %arg10[%c0_38, %c0_39], %54 {strides = array<i32>} : memref<128x1xf32, #tpu.memory_space<vmem>>, vector<128x1xf32>,
      %cst_40 = arith.constant 0.000000e+00 : f32
      %56 = vector.broadcast %cst_40 : f32 to vector<128x128xf32>
      %c0_41 = arith.constant 0 : index
      %c0_42 = arith.constant 0 : index
      %57 = vector.load %arg11[%c0_41, %c0_42] : memref<128x128xf32, #tpu.memory_space<vmem>>, vector<128x128xf32>
      tpu.vector_store %arg11[%c0_41, %c0_42], %56 {strides = array<i32>} : memref<128x128xf32, #tpu.memory_space<vmem>>, vector<128x128xf32>,
      %cst_43 = arith.constant 0.000000e+00 : f32
      %58 = vector.broadcast %cst_43 : f32 to vector<1x128x256xf32>
      %c0_44 = arith.constant 0 : index
      %c0_45 = arith.constant 0 : index
      %c0_46 = arith.constant 0 : index
      %59 = vector.load %arg8[%c0_44, %c0_45, %c0_46] : memref<1x128x256xf32, #tpu.memory_space<vmem>>, vector<1x128x256xf32>
      tpu.vector_store %arg8[%c0_44, %c0_45, %c0_46], %58 {strides = array<i32>} : memref<1x128x256xf32, #tpu.memory_space<vmem>>, vector<1x128x256xf32>,
    } else {
    }
    %c0 = arith.constant 0 : index
    %c0_1 = arith.constant 0 : index
    %c0_2 = arith.constant 0 : index
    %3 = vector.load %arg3[%c0, %c0_1, %c0_2] : memref<1x128x128xf32, #tpu.memory_space<vmem>>, vector<1x128x128xf32>
    %4 = vector.shape_cast %3 : vector<1x128x128xf32> to vector<128x128xf32>
    %cst = arith.constant 0.0883883461 : f32
    %5 = vector.broadcast %cst : f32 to vector<128x128xf32>
    %6 = arith.mulf %4, %5 : vector<128x128xf32>
    %c0_3 = arith.constant 0 : index
    %c0_4 = arith.constant 0 : index
    %c0_5 = arith.constant 0 : index
    %7 = vector.load %arg4[%c0_3, %c0_4, %c0_5] : memref<1x128x128xf32, #tpu.memory_space<vmem>>, vector<1x128x128xf32>
    %8 = vector.shape_cast %7 : vector<1x128x128xf32> to vector<128x128xf32>
    %c0_6 = arith.constant 0 : index
    %c0_7 = arith.constant 0 : index
    %c0_8 = arith.constant 0 : index
    %9 = vector.load %arg5[%c0_6, %c0_7, %c0_8] : memref<1x128x128xf32, #tpu.memory_space<vmem>>, vector<1x128x128xf32>
    %10 = vector.shape_cast %9 : vector<1x128x128xf32> to vector<128x128xf32>
    %cst_9 = arith.constant dense<0.000000e+00> : vector<128x128xf32>
    %11 = tpu.matmul %6, %8, %cst_9 {dimension_numbers = #tpu.dot_dimension_numbers<[1], [1], [0], [0], [0, 0, 1, 0], [], []>} : vector<128x128xf32>, vector<128x128xf32>, vector<128x128xf32> -> vector<128x128xf32>
    %c0_10 = arith.constant 0 : index
    %c0_11 = arith.constant 0 : index
    %c0_12 = arith.constant 0 : index
    %12 = vector.load %arg6[%c0_10, %c0_11, %c0_12] : memref<1x128x128xi8, #tpu.memory_space<vmem>>, vector<1x128x128xi8>
    %13 = vector.shape_cast %12 : vector<1x128x128xi8> to vector<128x128xi8>
    %c0_i8 = arith.constant 0 : i8
    %14 = vector.broadcast %c0_i8 : i8 to vector<128x128xi8>
    %15 = arith.cmpi ne, %13, %14 : vector<128x128xi8>
    %cst_13 = arith.constant -9.99999984E+17 : f32
    %16 = vector.broadcast %cst_13 : f32 to vector<128x128xf32>
    %17 = arith.select %15, %16, %11 : vector<128x128xi1>, vector<128x128xf32>
    %c0_14 = arith.constant 0 : index
    %c0_15 = arith.constant 0 : index
    %18 = vector.load %arg9[%c0_14, %c0_15] : memref<128x1xf32, #tpu.memory_space<vmem>>, vector<128x1xf32>
    %cst_16 = arith.constant dense<0xFF800000> : vector<128xf32>
    %19 = vector.multi_reduction <maximumf>, %17, %cst_16 [1] : vector<128x128xf32> to vector<128xf32>
    %20 = vector.shape_cast %19 : vector<128xf32> to vector<128x1xf32>
    %21 = arith.maximumf %18, %20 : vector<128x1xf32>
    %22 = arith.subf %18, %21 : vector<128x1xf32>
    %23 = math.exp %22 : vector<128x1xf32>
    %24 = vector.broadcast %21 : vector<128x1xf32> to vector<128x128xf32>
    %25 = arith.subf %17, %24 : vector<128x128xf32>
    %26 = math.exp %25 : vector<128x128xf32>
    %c0_17 = arith.constant 0 : index
    %c0_18 = arith.constant 0 : index
    %27 = vector.load %arg10[%c0_17, %c0_18] : memref<128x1xf32, #tpu.memory_space<vmem>>, vector<128x1xf32>
    %28 = arith.mulf %23, %27 : vector<128x1xf32>
    %cst_19 = arith.constant dense<0.000000e+00> : vector<128xf32>
    %29 = vector.multi_reduction <add>, %26, %cst_19 [1] : vector<128x128xf32> to vector<128xf32>
    %30 = vector.shape_cast %29 : vector<128xf32> to vector<128x1xf32>
    %31 = arith.addf %28, %30 : vector<128x1xf32>
    %c0_20 = arith.constant 0 : index
    %c0_21 = arith.constant 0 : index
    %32 = vector.load %arg10[%c0_20, %c0_21] : memref<128x1xf32, #tpu.memory_space<vmem>>, vector<128x1xf32>
    tpu.vector_store %arg10[%c0_20, %c0_21], %31 {strides = array<i32>} : memref<128x1xf32, #tpu.memory_space<vmem>>, vector<128x1xf32>,
    %c0_22 = arith.constant 0 : index
    %c0_23 = arith.constant 0 : index
    %33 = vector.load %arg11[%c0_22, %c0_23] : memref<128x128xf32, #tpu.memory_space<vmem>>, vector<128x128xf32>
    %34 = vector.broadcast %23 : vector<128x1xf32> to vector<128x128xf32>
    %35 = arith.mulf %34, %33 : vector<128x128xf32>
    %cst_24 = arith.constant dense<0.000000e+00> : vector<128x128xf32>
    %36 = tpu.matmul %26, %10, %cst_24 {dimension_numbers = #tpu.dot_dimension_numbers<[1], [0], [0], [1], [0, 0, 1, 1], [], []>} : vector<128x128xf32>, vector<128x128xf32>, vector<128x128xf32> -> vector<128x128xf32>
    %37 = arith.addf %35, %36 : vector<128x128xf32>
    %c0_25 = arith.constant 0 : index
    %c0_26 = arith.constant 0 : index
    %38 = vector.load %arg11[%c0_25, %c0_26] : memref<128x128xf32, #tpu.memory_space<vmem>>, vector<128x128xf32>
    tpu.vector_store %arg11[%c0_25, %c0_26], %37 {strides = array<i32>} : memref<128x128xf32, #tpu.memory_space<vmem>>, vector<128x128xf32>,
    %c0_27 = arith.constant 0 : index
    %c0_28 = arith.constant 0 : index
    %39 = vector.load %arg9[%c0_27, %c0_28] : memref<128x1xf32, #tpu.memory_space<vmem>>, vector<128x1xf32>
    tpu.vector_store %arg9[%c0_27, %c0_28], %21 {strides = array<i32>} : memref<128x1xf32, #tpu.memory_space<vmem>>, vector<128x1xf32>,
    %c0_i32_29 = arith.constant 0 : i32
    %40 = arith.cmpi sgt, %arg2, %c0_i32_29 : i32
    %41 = arith.extui %40 : i1 to i32
    %c0_i32_30 = arith.constant 0 : i32
    %42 = arith.cmpi ne, %41, %c0_i32_30 : i32
    scf.if %42 {
      %c0_34 = arith.constant 0 : index
      %c0_35 = arith.constant 0 : index
      %c0_36 = arith.constant 0 : index
      %52 = vector.load %arg8[%c0_34, %c0_35, %c0_36] : memref<1x128x256xf32, #tpu.memory_space<vmem>>, vector<1x128x256xf32>
      %53 = vector.shape_cast %52 : vector<1x128x256xf32> to vector<128x256xf32>
      %54 = vector.broadcast %23 : vector<128x1xf32> to vector<128x256xf32>
      %55 = arith.mulf %53, %54 : vector<128x256xf32>
      %c0_37 = arith.constant 0 : index
      %c0_38 = arith.constant 0 : index
      %c0_39 = arith.constant 0 : index
      %56 = vector.load %arg8[%c0_37, %c0_38, %c0_39] : memref<1x128x256xf32, #tpu.memory_space<vmem>>, vector<1x128x256xf32>
      %57 = vector.shape_cast %56 : vector<1x128x256xf32> to vector<128x256xf32>
      %58 = vector.shape_cast %55 : vector<128x256xf32> to vector<1x128x256xf32>
      tpu.vector_store %arg8[%c0_37, %c0_38, %c0_39], %58 {strides = array<i32>} : memref<1x128x256xf32, #tpu.memory_space<vmem>>, vector<1x128x256xf32>,
    } else {
    }
    %c128_i32 = arith.constant 128 : i32
    %43 = arith.muli %arg2, %c128_i32 : i32
    %44 = tpu.assume_multiple %43, 128 : i32
    %c0_31 = arith.constant 0 : index
    %c0_32 = arith.constant 0 : index
    %45 = arith.index_cast %44 : i32 to index
    %46 = vector.load %arg8[%c0_31, %c0_32, %45] : memref<1x128x256xf32, #tpu.memory_space<vmem>>, vector<1x128x128xf32>
    %47 = vector.shape_cast %46 : vector<1x128x128xf32> to vector<128x128xf32>
    %48 = vector.shape_cast %26 : vector<128x128xf32> to vector<1x128x128xf32>
    tpu.vector_store %arg8[%c0_31, %c0_32, %45], %48 {strides = array<i32>} : memref<1x128x256xf32, #tpu.memory_space<vmem>>, vector<1x128x128xf32>,
    %c1_i32 = arith.constant 1 : i32
    %49 = arith.cmpi eq, %arg2, %c1_i32 : i32
    %50 = arith.extui %49 : i1 to i32
    %c0_i32_33 = arith.constant 0 : i32
    %51 = arith.cmpi ne, %50, %c0_i32_33 : i32
    scf.if %51 {
      %c0_34 = arith.constant 0 : index
      %c0_35 = arith.constant 0 : index
      %52 = vector.load %arg10[%c0_34, %c0_35] : memref<128x1xf32, #tpu.memory_space<vmem>>, vector<128x1xf32>
      %53 = tpu.reciprocal %52 {approx = true} : vector<128x1xf32> -> vector<128x1xf32>
      %54 = arith.mulf %52, %53 : vector<128x1xf32>
      %cst_36 = arith.constant 2.000000e+00 : f32
      %55 = vector.broadcast %cst_36 : f32 to vector<128x1xf32>
      %56 = arith.subf %55, %54 : vector<128x1xf32>
      %57 = arith.mulf %53, %56 : vector<128x1xf32>
      %c0_37 = arith.constant 0 : index
      %c0_38 = arith.constant 0 : index
      %58 = vector.load %arg11[%c0_37, %c0_38] : memref<128x128xf32, #tpu.memory_space<vmem>>, vector<128x128xf32>
      %59 = vector.broadcast %57 : vector<128x1xf32> to vector<128x128xf32>
      %60 = arith.mulf %58, %59 : vector<128x128xf32>
      %c0_39 = arith.constant 0 : index
      %c0_40 = arith.constant 0 : index
      %c0_41 = arith.constant 0 : index
      %61 = vector.load %arg7[%c0_39, %c0_40, %c0_41] : memref<1x128x128xf32, #tpu.memory_space<vmem>>, vector<1x128x128xf32>
      %62 = vector.shape_cast %61 : vector<1x128x128xf32> to vector<128x128xf32>
      %63 = vector.shape_cast %60 : vector<128x128xf32> to vector<1x128x128xf32>
      tpu.vector_store %arg7[%c0_39, %c0_40, %c0_41], %63 {strides = array<i32>} : memref<1x128x128xf32, #tpu.memory_space<vmem>>, vector<1x128x128xf32>,
      %c0_42 = arith.constant 0 : index
      %c0_43 = arith.constant 0 : index
      %c0_44 = arith.constant 0 : index
      %64 = vector.load %arg8[%c0_42, %c0_43, %c0_44] : memref<1x128x256xf32, #tpu.memory_space<vmem>>, vector<1x128x256xf32>
      %65 = vector.shape_cast %64 : vector<1x128x256xf32> to vector<128x256xf32>
      %66 = vector.broadcast %57 : vector<128x1xf32> to vector<128x256xf32>
      %67 = arith.mulf %65, %66 : vector<128x256xf32>
      %c0_45 = arith.constant 0 : index
      %c0_46 = arith.constant 0 : index
      %c0_47 = arith.constant 0 : index
      %68 = vector.load %arg8[%c0_45, %c0_46, %c0_47] : memref<1x128x256xf32, #tpu.memory_space<vmem>>, vector<1x128x256xf32>
      %69 = vector.shape_cast %68 : vector<1x128x256xf32> to vector<128x256xf32>
      %70 = vector.shape_cast %67 : vector<128x256xf32> to vector<1x128x256xf32>
      tpu.vector_store %arg8[%c0_45, %c0_46, %c0_47], %70 {strides = array<i32>} : memref<1x128x256xf32, #tpu.memory_space<vmem>>, vector<1x128x256xf32>,
    } else {
    }
    return
  }
  func.func @transform_0(%arg0: i32, %arg1: i32, %arg2: i32) -> (i32, i32, i32) {
    %c0_i32 = arith.constant 0 : i32
    %c0_i32_0 = arith.constant 0 : i32
    return %arg0, %arg1, %c0_i32 : i32, i32, i32
  }
  func.func @transform_1(%arg0: i32, %arg1: i32, %arg2: i32) -> (i32, i32, i32) {
    %c0_i32 = arith.constant 0 : i32
    %c0_i32_0 = arith.constant 0 : i32
    return %arg0, %arg2, %c0_i32 : i32, i32, i32
  }
  func.func @transform_2(%arg0: i32, %arg1: i32, %arg2: i32) -> (i32, i32, i32) {
    %c0_i32 = arith.constant 0 : i32
    %c0_i32_0 = arith.constant 0 : i32
    return %arg0, %arg2, %c0_i32 : i32, i32, i32
  }
  func.func @transform_3(%arg0: i32, %arg1: i32, %arg2: i32) -> (i32, i32, i32) {
    %c0_i32 = arith.constant 0 : i32
    return %arg0, %arg1, %arg2 : i32, i32, i32
  }
  func.func @transform_4(%arg0: i32, %arg1: i32, %arg2: i32) -> (i32, i32, i32) {
    %c0_i32 = arith.constant 0 : i32
    %c0_i32_0 = arith.constant 0 : i32
    return %arg0, %arg1, %c0_i32 : i32, i32, i32
  }
  func.func @transform_5(%arg0: i32, %arg1: i32, %arg2: i32) -> (i32, i32, i32) {
    %c0_i32 = arith.constant 0 : i32
    %c0_i32_0 = arith.constant 0 : i32
    return %arg0, %arg1, %c0_i32 : i32, i32, i32
  }
}

</mosaic_0001>

<bundles_post_ra>
// kernel: tpu_custom_call.1
= control target key start
LH: loop header
LB: loop body
LE: loop exit
PB: predicated region body
PF: predicated region fallthrough
CT: control target
= control target key end

     0   :  { %s4318_s0 = inlined_call_operand.hbm [shape: f32[2,256,128], index: 0, kind: input, shape index: {}]   ;;  %s4319_s1 = inlined_call_operand.hbm [shape: f32[2,256,128], index: 1, kind: input, shape index: {}]   ;;  %s4320_s2 = inlined_call_operand.hbm [shape: f32[2,256,128], index: 2, kind: input, shape index: {}]   ;;  %s4321_s3 = inlined_call_operand.hbm [shape: s8[2,256,256], index: 3, kind: input, shape index: {}]   ;;  %s4322_s4 = inlined_call_operand.hbm [shape: f32[2,256,128], index: 4, kind: output, shape index: {0}]   ;;  %s4323_s5 = inlined_call_operand.hbm [shape: f32[2,256,256], index: 5, kind: output, shape index: {1}]  }
   0x1   :  { %4358 = sst [smem:[#allocation38_spill]] %s4318_s0 }
   0x2   :  { %4359 = sst [smem:[#allocation39_spill]] %s4319_s1 }
   0x3   :  { %4360 = sst [smem:[#allocation40_spill]] %s4320_s2 }
   0x4   :  { %4361 = sst [smem:[#allocation41_spill]] %s4321_s3 }
   0x5   :  { %4362 = sst [smem:[#allocation42_spill]] %s4322_s4 }
   0x6   :  { %4363 = sst [smem:[#allocation43_spill]] %s4323_s5 }
   0x7   :  { %11 = vsyncpa [#allocation6], 0 }
   0x8   :  { %13 = vsyncpa [#allocation6 + $0x1], 0 }
   0x9   :  { %14 = vsyncpa [#allocation9], 0 }
   0xa   :  { %16 = vsyncpa [#allocation9 + $0x1], 0 }
   0xb   :  { %17 = vsyncpa [#allocation12], 0 }
   0xc   :  { %19 = vsyncpa [#allocation12 + $0x1], 0 }
   0xd   :  { %20 = vsyncpa [#allocation7], 0 }
   0xe   :  { %22 = vsyncpa [#allocation7 + $0x1], 0 }
   0xf   :  { %23 = vsyncpa [#allocation15], 0 }
  0x10   :  { %25 = vsyncpa [#allocation15 + $0x1], 0  ;;  %s3030_s18 = smov 0   ;;  %s3032_s19 = smov 0  }
  0x11   :  { %s3034_s20 = smov 0   ;;  %s3036_s21 = smov 0  }
  0x12   :  { %s3038_s22 = smov 0   ;;  %s3040_s23 = smov 0  }
  0x13   :  { %s3042_s24 = smov 0   ;;  %s3044_s25 = smov 0  }
  0x14   :  { %s3046_s26 = smov 0   ;;  %s3048_s27 = smov 0  }
  0x15   :  { %s3050_s28 = smov 0   ;;  %s3052_s29 = smov 0  }
  0x16   :  { %s3054_s30 = smov 0   ;;  %s3056_s6 = smov 0  }
  0x17   :  { %s3058_s7 = smov 0   ;;  %s3060_s8 = smov 0  }
  0x18 LB: > { %4364 = sst [smem:[#allocation21_spill]] %s2921_s18  ;;  %s3109_s9 = sadd.s32 4294967295, %s2981_s8   ;;  %s2981_s8 = sphi %s3060_s8, %s31_s8   ;;  %s2977_s7 = sphi %s3058_s7, %s4463_s7   ;;  %s2973_s6 = sphi %s3056_s6, %s4462_s6   ;;  %s2969_s30 = sphi %s3054_s30, %s4448_s30   ;;  %s2965_s29 = sphi %s3052_s29, %s4461_s29   ;;  %s2961_s28 = sphi %s3050_s28, %s4460_s28   ;;  %s2957_s27 = sphi %s3048_s27, %s4459_s27   ;;  %s2953_s26 = sphi %s3046_s26, %s4458_s26   ;;  %s2949_s25 = sphi %s3044_s25, %s4457_s25   ;;  %s2945_s24 = sphi %s3042_s24, %s4445_s24   ;;  %s2941_s23 = sphi %s3040_s23, %s4456_s23   ;;  %s2937_s22 = sphi %s3038_s22, %s4455_s22   ;;  %s2933_s21 = sphi %s3036_s21, %s4444_s21   ;;  %s2929_s20 = sphi %s3034_s20, %s4454_s20   ;;  %s2925_s19 = sphi %s3032_s19, %s4453_s19   ;;  %s2921_s18 = sphi %s3030_s18, %s4451_s18  }
  0x19   : > { %4365 = sst [smem:[#allocation22_spill]] %s2925_s19  ;;  %s43_s10 = sadd.s32 1, %s2969_s30 }
  0x1a   : > { %4366 = sst [smem:[#allocation23_spill]] %s2937_s22  ;;  %p3112_p0 = scmp.ge.s32.totalorder %s43_s10, 2 }
  0x1b   : > { %4367 = sst [smem:[#allocation24_spill]] %s2945_s24  ;;  %p4334_p1 = scmp.eq.s32.totalorder %s2981_s8, 0 }
  0x1c   : > { %4368 = sst [smem:[#allocation25_spill]] %s2949_s25  ;;  %p4335_p2 = scmp.eq.s32.totalorder %s3109_s9, 0 }
  0x1d   : > { %4369 = sst [smem:[#allocation26_spill]] %s2957_s27  ;;  %s4465_s10 = smov (%p3112_p0, %s43_s10), 0 }
  0x1e   : > { %4370 = sst [smem:[#allocation27_spill]] %s2961_s28  ;;  %p94_p3 = scmp.ne.s32.totalorder %s2941_s23, %s2937_s22 }
  0x1f   : > { %4371 = sst [smem:[#allocation28_spill]] %s2965_s29  ;;  %s3128_s14 = ssub.s32 %s2969_s30, %s4465_s10 }
  0x20   : > { %4372 = sst [smem:[#allocation29_spill]] %s2969_s30  ;;  %p100_p4 = scmp.ne.s32.totalorder %s2937_s22, %s2933_s21 }
  0x21   : > { %4374 = sst [smem:[#allocation30_spill]] %s4465_s10  ;;  %p3133_p5 = por %p94_p3, %p4334_p1 }
  0x22   : > { %p3139_p6 = por %p100_p4, %p4335_p2  ;;  %p2430_p7 = scmp.lt.s32.totalorder %s2981_s8, 8 }
  0x23   : > { %s4341_s17 = sshll.u32 %s2977_s7, 5  ;;  %s261_s12 = sand.u32 1, %s2981_s8  }
  0x24   : > { %s4376_s16 = scalar_select %p3139_p6, 1, 0 }
  0x25   : > { %s263_s13 = sand.u32 1, %s2941_s23   ;;  %s2185_s10 = sshll.u32 %s2969_s30, 4 }
  0x26   : > { %4377 = sst [smem:[#allocation31_spill]] %s4376_s16  ;;  %s2184_s5 = sshll.u32 %s263_s13, 7 }
  0x27   : > { %s271_s4 = sadd.s32 %s2185_s10, %s4341_s17  ;;  %s265_s29 = scalar_lea.vmem [#allocation8], %s2184_s5 }
  0x28   : > { %s2187_s21 = sshll.u32 %s271_s4, 7  ;;  %s274_s28 = sshll.u32 %s265_s29, 4  ;;  %s275_s28 = int_to_ptr.vmem [resolvable:$true] %s274_s28 }
  0x29   : > { %s4378_s1 = sld [smem:[#allocation39_spill]]  ;;  %p3157_p8 = pnand %p2430_p7, %p3133_p5 }
  0x2a   : > { %s4380_s2 = sld [smem:[#allocation40_spill]]  ;;  %s288_s4 = scalar_lea.vmem [#allocation10], %s2184_s5 }
  0x2b   : > { %s297_s29 = sshll.u32 %s288_s4, 4  ;;  %s3168_s22 = scalar_lea.sflag [#allocation9], %s261_s12  ;;  %s3166_s29 = int_to_ptr.vmem [resolvable:$true] %s297_s29 }
  0x2c   : > { %p4338_p9 = pneg %p3157_p8  ;;  %s2684_s27 = scalar_lea.vmem %s275_s28, 2048 }
  0x2d   : > { %p2685_p10 = scmp.ne.s32.totalorder %s275_s28, %s2684_s27  ;;  %s2983_s13 = smov [#allocation8]  }
  0x2e   : > { %s2689_s18 = sshll.u32 %s2983_s13, 4  ;;  %s2690_s18 = int_to_ptr.vmem [resolvable:$false] %s2689_s18 }
  0x2f   : > { %s273_s3 = scalar_lea.hbm %s4378_s1, %s2187_s21  ;;  %p2687_p11 = pnand %p2685_p10, %p4338_p9 }
  0x30   : > { %s3164_s10 = scalar_lea.hbm %s4380_s2, %s2187_s21  ;;  %s2691_s19 = scalar_lea.vmem %s2690_s18, 4096 }
  0x31   : > { %p2688_p12 = pneg %p2687_p11  ;;  %p2692_p13 = scmp.lt.s32.totalorder %s275_s28, %s2690_s18 }
  0x32   : > { %p2693_p3 = scmp.lt.s32.totalorder %s2691_s19, %s2684_s27 }
  0x34   : > { %p2694_p4 = por %p2693_p3, %p2692_p13 }
  0x36   : > { %p2695_p5 = pnand %p2694_p4, %p2688_p12 }
  0x38   : > { %2698 = shalt.err (!%p2695_p5)
}
  0x39   : > { %s4336_s5 = smov 128   ;;  %s4339_s12 = smov 8  }
  0x3a   : > { %2416 = dma.hbm_to_vmem [thread:$0]  (!%p3157_p8), %s273_s3, 2048, %s275_s28, %s3168_s22, %s4336_s5, %s4336_s5, %s4339_s12  }
  0x3b   : > { %p2197_p10 = scmp.ge.s32.totalorder %s2981_s8, 1  ;;  %p330_p11 = scmp.lt.s32.totalorder %s2981_s8, 9 }
  0x3c   : > { %s2177_s21 = sadd.s32 4294967294, %s2981_s8   ;;  %s46_s4 = sadd.s32 1, %s2973_s6 }
  0x3d   : > { %p3183_p12 = pnand %p2197_p10, %p330_p11  ;;  %s59_s27 = sadd.s32 1, %s2953_s26 }
  0x3e   : > { %s4467_s4 = smov (!%p3112_p0, %s46_s4), %s2973_s6  ;;  %p66_p13 = scmp.ne.s32.totalorder %s2953_s26, %s2949_s25 }
  0x3f   : > { %s4381_s15 = scalar_select %p3183_p12, 1, 0 }
  0x40   : > { %p72_p3 = scmp.ne.s32.totalorder %s2949_s25, %s2945_s24  ;;  %p48_p4 = scmp.ge.s32.totalorder %s4467_s4, 2 }
  0x41   : > { %4382 = sst [smem:[#allocation32_spill]] %s4381_s15  ;;  %p184_p5 = scmp.eq.s32.totalorder %s3109_s9, 7 }
  0x42   : > { %p3200_p10 = por %p4334_p1, %p66_p13  ;;  %p3209_p11 = por %p4335_p2, %p72_p3 }
  0x43   : > { %s4469_s4 = smov (%p48_p4, %s4467_s4), 0  ;;  %s4387_s11 = sadd.s32 1, %s2977_s7 }
  0x44   : > { %s4384_s28 = scalar_select %p3209_p11, 1, 0 }
  0x45   : > { %4386 = sst [smem:[#allocation34_spill]] %s4469_s4  ;;  %s4471_s11 = smov (!%p48_p4, %s4387_s11), %s2977_s7 }
  0x46   : > { %4385 = sst [smem:[#allocation33_spill]] %s4384_s28  ;;  %s55_s13 = ssub.s32 %s2973_s6, %s4469_s4 }
  0x47   : > { %p3220_p0 = por %p184_p5, %p66_p13  ;;  %p52_p1 = scmp.ge.s32.totalorder %s4471_s11, 2 }
  0x48   : > { %p190_p2 = scmp.eq.s32.totalorder %s2177_s21, 7  ;;  %s4350_s19 = sand.u32 1, %s2953_s26  }
  0x49   : > { %s4388_s18 = scalar_select %p3220_p0, 1, 0 }
  0x4a   : > { %s2181_s5 = sshll.u32 %s2973_s6, 4  ;;  %s4473_s11 = smov (%p52_p1, %s4471_s11), 0 }
  0x4b   : > { %4389 = sst [smem:[#allocation35_spill]] %s4388_s18  ;;  %p3231_p9 = por %p190_p2, %p72_p3 }
  0x4c   : > { %4390 = sst [smem:[#allocation36_spill]] %s4473_s11  ;;  %s54_s17 = ssub.s32 %s2977_s7, %s4473_s11 }
  0x4d   : > { %s4391_s12 = scalar_select %p3231_p9, 1, 0 }
  0x4e   : > { %s2180_s1 = sshll.u32 %s4350_s19, 7  ;;  %s56_s2 = sor.u32 %s55_s13, %s54_s17 }
  0x4f   : > { %4392 = sst [smem:[#allocation37_spill]] %s4391_s12  ;;  %s84_s4 = sor.u32 %s3128_s14, %s54_s17 }
  0x50   : > { %p57_p13 = scmp.eq.s32.totalorder %s56_s2, 0  ;;  %p85_p4 = scmp.eq.s32.totalorder %s84_s4, 0 }
  0x51   : > { %s142_s21 = sor.u32 %s3128_s14, %s56_s2  ;;  %s4393_s24 = sadd.s32 1, %s2941_s23 }
  0x52   : > { %s3242_s18 = scalar_select %p57_p13, %s2953_s26, %s59_s27  }
  0x53   : > { %s3247_s28 = scalar_select %p85_p4, %s2941_s23, %s4393_s24  }
  0x54   : > { %p3249_p1 = scmp.eq.s32.totalorder %s142_s21, 0  ;;  %s4395_s11 = sshll.u32 %s2977_s7, 5 }
  0x55   : > { %s248_s19 = sadd.s32 %s4395_s11, %s2181_s5  ;;  %s242_s13 = scalar_lea.vmem [#allocation5], %s2180_s1 }
  0x56   : > { %s2183_s25 = sshll.u32 %s248_s19, 7  ;;  %s251_s15 = sshll.u32 %s242_s13, 4  ;;  %s3260_s15 = int_to_ptr.vmem [resolvable:$true] %s251_s15 }
  0x57   : > { %s4396_s0 = sld [smem:[#allocation38_spill]]  ;;  %p3266_p2 = pnand %p2430_p7, %p3200_p10 }
  0x58   : > { %s2712_s24 = scalar_lea.vmem %s3166_s29, 2048  ;;  %p4398_p5 = pneg %p3157_p8 }
  0x59   : > { %p2713_p3 = scmp.ne.s32.totalorder %s3166_s29, %s2712_s24  ;;  %s2986_s1 = smov [#allocation10]  }
  0x5a   : > { %s2717_s14 = sshll.u32 %s2986_s1, 4  ;;  %s2718_s14 = int_to_ptr.vmem [resolvable:$false] %s2717_s14 }
  0x5b   : > { %p2715_p13 = pnand %p2713_p3, %p4398_p5  ;;  %s2719_s30 = scalar_lea.vmem %s2718_s14, 4096 }
  0x5c   : > { %p2720_p9 = scmp.lt.s32.totalorder %s3166_s29, %s2718_s14  ;;  %p2721_p0 = scmp.lt.s32.totalorder %s2719_s30, %s2712_s24 }
  0x5d   : > { %s3258_s4 = scalar_lea.hbm %s4396_s0, %s2183_s25  ;;  %p2716_p4 = pneg %p2715_p13 }
  0x5e   : > { %p2722_p6 = por %p2721_p0, %p2720_p9 }
  0x60   : > { %p2723_p11 = pnand %p2722_p6, %p2716_p4 }
  0x62   : > { %2726 = shalt.err (!%p2723_p11)
}
  0x63   : > { %s4399_s25 = smov 8   ;;  %s4400_s5 = smov 128  }
  0x64   : > { %2419 = dma.hbm_to_vmem [thread:$0]  (!%p3157_p8), %s3164_s10, 2048, %s3166_s29, %s3168_s22, %s4400_s5, %s4400_s5, %s4399_s25  }
  0x65   : > { %s4401_s27 = sand.u32 1, %s2953_s26   ;;  %p2729_p9 = pneg %p3266_p2 }
  0x66   : > { %s239_s3 = scalar_lea.sflag [#allocation6], %s4401_s27  ;;  %s2740_s11 = scalar_lea.vmem %s3260_s15, 2048 }
  0x67   : > { %p2741_p6 = scmp.ne.s32.totalorder %s3260_s15, %s2740_s11  ;;  %s2987_s16 = smov [#allocation5]  }
  0x68   : > { %s2745_s19 = sshll.u32 %s2987_s16, 4  ;;  %s2746_s19 = int_to_ptr.vmem [resolvable:$false] %s2745_s19 }
  0x69   : > { %p2743_p10 = pnand %p2741_p6, %p2729_p9  ;;  %s2747_s21 = scalar_lea.vmem %s2746_s19, 4096 }
  0x6a   : > { %p2748_p0 = scmp.lt.s32.totalorder %s3260_s15, %s2746_s19  ;;  %p2749_p3 = scmp.lt.s32.totalorder %s2747_s21, %s2740_s11 }
  0x6b   : > { %p2744_p11 = pneg %p2743_p10 }
  0x6c   : > { %p2750_p5 = por %p2749_p3, %p2748_p0 }
  0x6e   : > { %p2751_p13 = pnand %p2750_p5, %p2744_p11 }
  0x70   : > { %2754 = shalt.err (!%p2751_p13)
}
  0x71   : > { %s4402_s10 = sld [smem:[#allocation22_spill]]  ;;  %s145_s13 = sadd.s32 1, %s2929_s20 }
  0x72   : > { %s4403_s29 = sld [smem:[#allocation21_spill]]  ;;  %p4405_p4 = scmp.eq.s32.totalorder %s2981_s8, 0 }
  0x73   : > { %s4404_s22 = sld [smem:[#allocation29_spill]]  ;;  %s307_s24 = sand.u32 1, %s2929_s20  }
  0x74   : > { %2413 = dma.hbm_to_vmem [thread:$0]  (!%p3266_p2), %s3258_s4, 2048, %s3260_s15, %s239_s3, %s4400_s5, %s4400_s5, %s4399_s25  }
  0x75   : > { %s3304_s17 = scalar_select %p3249_p1, %s2929_s20, %s145_s13  }
  0x76   : > { %s2220_s1 = sshll.u32 %s2973_s6, 3  ;;  %p4407_p10 = scmp.eq.s32.totalorder %s3109_s9, 0 }
  0x77   : > { %p152_p8 = scmp.ne.s32.totalorder %s2929_s20, %s4402_s10  ;;  %s2192_s15 = sshll.u32 %s307_s24, 5 }
  0x78   : > { %p158_p6 = scmp.ne.s32.totalorder %s4402_s10, %s4403_s29  ;;  %s2195_s12 = sshll.u32 %s2977_s7, 4 }
  0x79   : > { %p3308_p9 = por %p152_p8, %p4405_p4  ;;  %s317_s4 = sadd.s32 %s4404_s22, %s2220_s1 }
  0x7a   : > { %p3318_p11 = por %p158_p6, %p4407_p10  ;;  %s319_s30 = sadd.s32 %s2195_s12, %s317_s4 }
  0x7b   : > { %s311_s27 = scalar_lea.vmem [#allocation11], %s2192_s15  ;;  %s2196_s11 = sshll.u32 %s319_s30, 7 }
  0x7c   : > { %s322_s3 = sshll.u32 %s311_s27, 4  ;;  %s4409_s21 = sld [smem:[#allocation41_spill]]  ;;  %s323_s3 = int_to_ptr.vmem [resolvable:$true] %s322_s3 }
  0x7d   : > { %p3331_p1 = pnand %p2430_p7, %p3308_p9  ;;  %s308_s29 = scalar_lea.sflag [#allocation12], %s307_s24 }
  0x7e   : > { %s2768_s22 = scalar_lea.vmem %s323_s3, 512  ;;  %s2988_s1 = smov [#allocation11]  }
  0x7f   : > { %p2757_p2 = pneg %p3331_p1  ;;  %p2769_p0 = scmp.ne.s32.totalorder %s323_s3, %s2768_s22 }
  0x80   : > { %s2773_s15 = sshll.u32 %s2988_s1, 4  ;;  %s2774_s15 = int_to_ptr.vmem [resolvable:$false] %s2773_s15 }
  0x81   : > { %p2771_p3 = pnand %p2769_p0, %p2757_p2  ;;  %s2775_s4 = scalar_lea.vmem %s2774_s15, 1024 }
  0x82   : > { %s321_s13 = scalar_lea.hbm %s4409_s21, %s2196_s11  ;;  %p2776_p13 = scmp.lt.s32.totalorder %s323_s3, %s2774_s15 }
  0x83   : > { %p2772_p5 = pneg %p2771_p3  ;;  %p2777_p8 = scmp.lt.s32.totalorder %s2775_s4, %s2768_s22 }
  0x85   : > { %p2778_p4 = por %p2777_p8, %p2776_p13 }
  0x87   : > { %p2779_p6 = pnand %p2778_p4, %p2772_p5 }
  0x89   : > { %2782 = shalt.err (!%p2779_p6)
}
  0x8a   : > { %s2989_s2 = smov 256   ;;  %334 = sbr.rel (%p3183_p12) target bundleno = 1282 (0x502), region = 36 }
  0x8b   : > { %2422 = dma.hbm_to_vmem [thread:$0]  (!%p3331_p1), %s321_s13, 512, %s323_s3, %s308_s29, %s2989_s2, %s4400_s5, %s4399_s25  }
  0x8c   : > { %s4412_s12 = sld [smem:[#allocation25_spill]] (!%p3183_p12) }
  0x8d   : > { %s4413_s30 = sld [smem:[#allocation33_spill]] (!%p3183_p12) }
  0x92   : > { %s3344_s27 = sand.u32 1, %s4412_s12  }
  0x93   : > { %s2198_s11 = sshll.u32 %s3344_s27, 7  ;;  %s337_s16 = scalar_lea.sflag [#allocation6], %s3344_s27 }
  0x94   : > { %s3348_s19 = scalar_lea.vmem [#allocation5], %s2198_s11  ;;  %p4414_p7 = scmp.ne.s32.totalorder %s4413_s30, 0 }
  0x96   : > { %2900 = dma.done.wait (%p4414_p7), %s337_s16, 2048  }
  0x97   : > { %2902 = vsyncadd (%p4414_p7), %s337_s16, 4294965248  ;;  %s4415_s25 = sld [smem:[#allocation23_spill]]  ;;  %s345_s3 = sand.u32 1, %s3109_s9  }
  0x98   : > { %s4416_s5 = sld [smem:[#allocation31_spill]]  ;;  %s346_s10 = scalar_lea.sflag [#allocation9], %s345_s3 }
  0x9d   : > { %s347_s21 = sand.u32 1, %s4415_s25  }
  0x9e   : > { %s2199_s13 = sshll.u32 %s347_s21, 7  ;;  %p4417_p12 = scmp.ne.s32.totalorder %s4416_s5, 0 }
  0x9f   : > { %s3356_s29 = scalar_lea.vmem [#allocation8], %s2199_s13 }
  0xa0   : > { %2904 = dma.done.wait (%p4417_p12), %s346_s10, 4096  }
  0xa1   : > { %2906 = vsyncadd (%p4417_p12), %s346_s10, 4294963200  ;;  %s4418_s22 = sld [smem:[#allocation22_spill]]  ;;  %s3363_s4 = scalar_lea.vmem [#allocation10], %s2199_s13 }
  0xa7   : > { %s363_s1 = sand.u32 1, %s4418_s22  }
  0xa8   : > { %s2201_s15 = sshll.u32 %s363_s1, 5  ;;  %s364_s2 = scalar_lea.sflag [#allocation12], %s363_s1 }
  0xa9   : > { %s3365_s24 = scalar_lea.vmem [#allocation11], %s2201_s15 }
  0xaa   : > { %2908 = dma.done.wait (%p3318_p11), %s364_s2, 512  }
  0xab   : > { %2910 = vsyncadd (%p3318_p11), %s364_s2, 4294966784  ;;  %s2203_s9 = sshll.u32 %s3344_s27, 8  ;;  %s3372_s12 = scalar_lea.vmem [#allocation13], %s2198_s11 }
  0xac   : > { %s3374_s30 = scalar_lea.vmem [#allocation14], %s2203_s9  ;;  %s4419_s16 = sld [smem:[#allocation26_spill]] }
  0xb2   : > { %p2204_p9 = scmp.ne.s32.totalorder %s4419_s16, 0 }
  0xb4   : > { %425 = sbr.rel (%p2204_p9) target bundleno = 226 (0xe2), region = 56 }
  0xb9   : > { %vm426_vm0 = vcmask 7168   ;;  %v2990_v0 = vmov -inf   ;;  %v2991_v1 = vmov 0.0  }
  0xba   : > { %427 = vst.msk [vmem:[#allocation2] sm:$0xff] %vm426_vm0, %v2990_v0  ;;  %428 = vst.msk [vmem:[#allocation2 + $0x8] sm:$0xff] %vm426_vm0, %v2990_v0 }
  0xbb   : > { %429 = vst.msk [vmem:[#allocation2 + $0x10] sm:$0xff] %vm426_vm0, %v2990_v0  ;;  %430 = vst.msk [vmem:[#allocation2 + $0x18] sm:$0xff] %vm426_vm0, %v2990_v0 }
  0xbc   : > { %431 = vst.msk [vmem:[#allocation2 + $0x20] sm:$0xff] %vm426_vm0, %v2990_v0  ;;  %432 = vst.msk [vmem:[#allocation2 + $0x28] sm:$0xff] %vm426_vm0, %v2990_v0 }
  0xbd   : > { %433 = vst.msk [vmem:[#allocation2 + $0x30] sm:$0xff] %vm426_vm0, %v2990_v0  ;;  %434 = vst.msk [vmem:[#allocation2 + $0x38] sm:$0xff] %vm426_vm0, %v2990_v0 }
  0xbe   : > { %435 = vst.msk [vmem:[#allocation2 + $0x40] sm:$0xff] %vm426_vm0, %v2990_v0  ;;  %436 = vst.msk [vmem:[#allocation2 + $0x48] sm:$0xff] %vm426_vm0, %v2990_v0 }
  0xbf   : > { %437 = vst.msk [vmem:[#allocation2 + $0x50] sm:$0xff] %vm426_vm0, %v2990_v0  ;;  %438 = vst.msk [vmem:[#allocation2 + $0x58] sm:$0xff] %vm426_vm0, %v2990_v0 }
  0xc0   : > { %439 = vst.msk [vmem:[#allocation2 + $0x60] sm:$0xff] %vm426_vm0, %v2990_v0  ;;  %440 = vst.msk [vmem:[#allocation2 + $0x68] sm:$0xff] %vm426_vm0, %v2990_v0 }
  0xc1   : > { %441 = vst.msk [vmem:[#allocation2 + $0x70] sm:$0xff] %vm426_vm0, %v2990_v0  ;;  %442 = vst.msk [vmem:[#allocation2 + $0x78] sm:$0xff] %vm426_vm0, %v2990_v0 }
  0xc2   : > { %443 = vst.msk [vmem:[#allocation3] sm:$0xff] %vm426_vm0, %v2991_v1  ;;  %444 = vst.msk [vmem:[#allocation3 + $0x8] sm:$0xff] %vm426_vm0, %v2991_v1 }
  0xc3   : > { %445 = vst.msk [vmem:[#allocation3 + $0x10] sm:$0xff] %vm426_vm0, %v2991_v1  ;;  %446 = vst.msk [vmem:[#allocation3 + $0x18] sm:$0xff] %vm426_vm0, %v2991_v1 }
  0xc4   : > { %447 = vst.msk [vmem:[#allocation3 + $0x20] sm:$0xff] %vm426_vm0, %v2991_v1  ;;  %448 = vst.msk [vmem:[#allocation3 + $0x28] sm:$0xff] %vm426_vm0, %v2991_v1 }
  0xc5   : > { %449 = vst.msk [vmem:[#allocation3 + $0x30] sm:$0xff] %vm426_vm0, %v2991_v1  ;;  %450 = vst.msk [vmem:[#allocation3 + $0x38] sm:$0xff] %vm426_vm0, %v2991_v1 }
  0xc6   : > { %451 = vst.msk [vmem:[#allocation3 + $0x40] sm:$0xff] %vm426_vm0, %v2991_v1  ;;  %452 = vst.msk [vmem:[#allocation3 + $0x48] sm:$0xff] %vm426_vm0, %v2991_v1 }
  0xc7   : > { %453 = vst.msk [vmem:[#allocation3 + $0x50] sm:$0xff] %vm426_vm0, %v2991_v1  ;;  %454 = vst.msk [vmem:[#allocation3 + $0x58] sm:$0xff] %vm426_vm0, %v2991_v1 }
  0xc8   : > { %455 = vst.msk [vmem:[#allocation3 + $0x60] sm:$0xff] %vm426_vm0, %v2991_v1  ;;  %456 = vst.msk [vmem:[#allocation3 + $0x68] sm:$0xff] %vm426_vm0, %v2991_v1 }
  0xc9   : > { %457 = vst.msk [vmem:[#allocation3 + $0x70] sm:$0xff] %vm426_vm0, %v2991_v1  ;;  %458 = vst.msk [vmem:[#allocation3 + $0x78] sm:$0xff] %vm426_vm0, %v2991_v1 }
  0xca   : > { %459 = vst [vmem:[#allocation4 + $0x30] sm:$0xff] %v2991_v1  ;;  %460 = vst [vmem:[#allocation4] sm:$0xff] %v2991_v1 }
  0xcb   : > { %461 = vst [vmem:[#allocation4 + $0x58] sm:$0xff] %v2991_v1  ;;  %462 = vst [vmem:[#allocation4 + $0x18] sm:$0xff] %v2991_v1 }
  0xcc   : > { %463 = vst [vmem:[#allocation4 + $0x50] sm:$0xff] %v2991_v1  ;;  %464 = vst [vmem:[#allocation4 + $0x68] sm:$0xff] %v2991_v1 }
  0xcd   : > { %465 = vst [vmem:[#allocation4 + $0x8] sm:$0xff] %v2991_v1  ;;  %466 = vst [vmem:[#allocation4 + $0x48] sm:$0xff] %v2991_v1 }
  0xce   : > { %467 = vst [vmem:[#allocation4 + $0x40] sm:$0xff] %v2991_v1  ;;  %468 = vst [vmem:[#allocation4 + $0x20] sm:$0xff] %v2991_v1 }
  0xcf   : > { %469 = vst [vmem:[#allocation4 + $0x10] sm:$0xff] %v2991_v1  ;;  %470 = vst [vmem:[#allocation4 + $0x38] sm:$0xff] %v2991_v1 }
  0xd0   : > { %471 = vst [vmem:[#allocation4 + $0x60] sm:$0xff] %v2991_v1  ;;  %472 = vst [vmem:[#allocation4 + $0x70] sm:$0xff] %v2991_v1 }
  0xd1   : > { %473 = vst [vmem:[#allocation4 + $0x78] sm:$0xff] %v2991_v1  ;;  %474 = vst [vmem:[#allocation4 + $0x28] sm:$0xff] %v2991_v1 }
  0xd2   : > { %475 = vst [vmem:[%s3374_s30] sm:$0xff] %v2991_v1  ;;  %476 = vst [vmem:[%s3374_s30 + $0x8] sm:$0xff] %v2991_v1 }
  0xd3   : > { %477 = vst [vmem:[%s3374_s30 + $0x10] sm:$0xff] %v2991_v1  ;;  %478 = vst [vmem:[%s3374_s30 + $0x18] sm:$0xff] %v2991_v1 }
  0xd4   : > { %479 = vst [vmem:[%s3374_s30 + $0x20] sm:$0xff] %v2991_v1  ;;  %480 = vst [vmem:[%s3374_s30 + $0x28] sm:$0xff] %v2991_v1 }
  0xd5   : > { %481 = vst [vmem:[%s3374_s30 + $0x30] sm:$0xff] %v2991_v1  ;;  %482 = vst [vmem:[%s3374_s30 + $0x38] sm:$0xff] %v2991_v1 }
  0xd6   : > { %483 = vst [vmem:[%s3374_s30 + $0x40] sm:$0xff] %v2991_v1  ;;  %484 = vst [vmem:[%s3374_s30 + $0x48] sm:$0xff] %v2991_v1 }
  0xd7   : > { %485 = vst [vmem:[%s3374_s30 + $0x50] sm:$0xff] %v2991_v1  ;;  %486 = vst [vmem:[%s3374_s30 + $0x58] sm:$0xff] %v2991_v1 }
  0xd8   : > { %487 = vst [vmem:[%s3374_s30 + $0x60] sm:$0xff] %v2991_v1  ;;  %488 = vst [vmem:[%s3374_s30 + $0x68] sm:$0xff] %v2991_v1 }
  0xd9   : > { %489 = vst [vmem:[%s3374_s30 + $0x70] sm:$0xff] %v2991_v1  ;;  %490 = vst [vmem:[%s3374_s30 + $0x78] sm:$0xff] %v2991_v1 }
  0xda   : > { %491 = vst [vmem:[%s3374_s30 + $0x80] sm:$0xff] %v2991_v1  ;;  %492 = vst [vmem:[%s3374_s30 + $0x88] sm:$0xff] %v2991_v1 }
  0xdb   : > { %493 = vst [vmem:[%s3374_s30 + $0x90] sm:$0xff] %v2991_v1  ;;  %494 = vst [vmem:[%s3374_s30 + $0x98] sm:$0xff] %v2991_v1 }
  0xdc   : > { %495 = vst [vmem:[%s3374_s30 + $0xa0] sm:$0xff] %v2991_v1  ;;  %496 = vst [vmem:[%s3374_s30 + $0xa8] sm:$0xff] %v2991_v1 }
  0xdd   : > { %497 = vst [vmem:[%s3374_s30 + $0xb0] sm:$0xff] %v2991_v1  ;;  %498 = vst [vmem:[%s3374_s30 + $0xb8] sm:$0xff] %v2991_v1 }
  0xde   : > { %499 = vst [vmem:[%s3374_s30 + $0xc0] sm:$0xff] %v2991_v1  ;;  %500 = vst [vmem:[%s3374_s30 + $0xc8] sm:$0xff] %v2991_v1 }
  0xdf   : > { %501 = vst [vmem:[%s3374_s30 + $0xd0] sm:$0xff] %v2991_v1  ;;  %502 = vst [vmem:[%s3374_s30 + $0xd8] sm:$0xff] %v2991_v1 }
  0xe0   : > { %503 = vst [vmem:[%s3374_s30 + $0xe0] sm:$0xff] %v2991_v1  ;;  %504 = vst [vmem:[%s3374_s30 + $0xe8] sm:$0xff] %v2991_v1 }
  0xe1   : > { %505 = vst [vmem:[%s3374_s30 + $0xf0] sm:$0xff] %v2991_v1  ;;  %506 = vst [vmem:[%s3374_s30 + $0xf8] sm:$0xff] %v2991_v1 }
  0xe2 PF: > { %v554_v2 = vld [vmem:[%s3356_s29 + $0x78] sm:$0xff]  ;;  %v553_v3 = vld [vmem:[%s3356_s29 + $0x70] sm:$0xff]  ;;  %v552_v4 = vld [vmem:[%s3356_s29 + $0x68] sm:$0xff]  ;;  %v2992_v50 = vmov 0   ;;  %s4430_s14 = sld [smem:[#allocation26_spill]] }
  0xe3   : > { %2286 = vmatprep.subr.mxu0 %v554_v2  ;;  %v507_v5 = vld [vmem:[%s3348_s19] sm:$0xff]  ;;  %v550_v8 = vld [vmem:[%s3356_s29 + $0x58] sm:$0xff]  ;;  %v549_v9 = vld [vmem:[%s3356_s29 + $0x50] sm:$0xff]  ;;  %2571 = vset.pattern.permute.xlu0 %v2992_v50 }
  0xe4   : > { %2287 = vmatpush3.xpose.msra.mxu0 %v554_v2  ;;  %v523_v6 = vmul.f32 0.088388346, %v507_v5  ;;  %v551_v7 = vld [vmem:[%s3356_s29 + $0x60] sm:$0xff]  ;;  %v548_v10 = vld [vmem:[%s3356_s29 + $0x48] sm:$0xff]  ;;  %v546_v12 = vld [vmem:[%s3356_s29 + $0x38] sm:$0xff]  ;;  %2572 = vset.pattern.permute.xlu1 %v2992_v50 }
  0xe5   : > { %2288 = vmatprep.subr.mxu0 %v553_v3  ;;  %v547_v11 = vld [vmem:[%s3356_s29 + $0x40] sm:$0xff]  ;;  %v545_v13 = vld [vmem:[%s3356_s29 + $0x30] sm:$0xff]  ;;  %v544_v14 = vld [vmem:[%s3356_s29 + $0x28] sm:$0xff] }
  0xe6   : > { %2318 = vmatprep.mubr.f32.mxu0 %v523_v6  ;;  %v543_v15 = vld [vmem:[%s3356_s29 + $0x20] sm:$0xff]  ;;  %v542_v16 = vld [vmem:[%s3356_s29 + $0x18] sm:$0xff]  ;;  %v541_v17 = vld [vmem:[%s3356_s29 + $0x10] sm:$0xff] }
  0xe7   : > { %v540_v18 = vld [vmem:[%s3356_s29 + $0x8] sm:$0xff]  ;;  %v539_v19 = vld [vmem:[%s3356_s29] sm:$0xff]  ;;  %v509_v21 = vld [vmem:[%s3348_s19 + $0x10] sm:$0xff] }
  0xe8   : > { %2289 = vmatpush3.xpose.msra.mxu0 %v553_v3  ;;  %v508_v20 = vld [vmem:[%s3348_s19 + $0x8] sm:$0xff]  ;;  %v525_v23 = vmul.f32 0.088388346, %v509_v21  ;;  %v510_v24 = vld [vmem:[%s3348_s19 + $0x18] sm:$0xff]  ;;  %v511_v25 = vld [vmem:[%s3348_s19 + $0x20] sm:$0xff]  ;;  %p2205_p10 = scmp.le.s32.totalorder %s4430_s14, 0 }
  0xe9   : > { %2290 = vmatprep.subr.mxu0 %v552_v4  ;;  %v524_v22 = vmul.f32 0.088388346, %v508_v20  ;;  %v526_v26 = vmul.f32 0.088388346, %v510_v24  ;;  %v527_v27 = vmul.f32 0.088388346, %v511_v25 }
  0xea   : > { %v512_v28 = vld [vmem:[%s3348_s19 + $0x28] sm:$0xff]  ;;  %v513_v29 = vld [vmem:[%s3348_s19 + $0x30] sm:$0xff]  ;;  %v514_v32 = vld [vmem:[%s3348_s19 + $0x38] sm:$0xff] }
  0xeb   : > { %v528_v30 = vmul.f32 0.088388346, %v512_v28  ;;  %v529_v31 = vmul.f32 0.088388346, %v513_v29  ;;  %v515_v33 = vld [vmem:[%s3348_s19 + $0x40] sm:$0xff]  ;;  %v516_v36 = vld [vmem:[%s3348_s19 + $0x48] sm:$0xff] }
  0xec   : > { %2291 = vmatpush3.xpose.msra.mxu0 %v552_v4  ;;  %v530_v34 = vmul.f32 0.088388346, %v514_v32  ;;  %v531_v35 = vmul.f32 0.088388346, %v515_v33  ;;  %v517_v37 = vld [vmem:[%s3348_s19 + $0x50] sm:$0xff]  ;;  %v518_v40 = vld [vmem:[%s3348_s19 + $0x58] sm:$0xff] }
  0xed   : > { %2292 = vmatprep.subr.mxu0 %v551_v7  ;;  %v532_v38 = vmul.f32 0.088388346, %v516_v36  ;;  %v533_v39 = vmul.f32 0.088388346, %v517_v37  ;;  %v519_v41 = vld [vmem:[%s3348_s19 + $0x60] sm:$0xff]  ;;  %v520_v44 = vld [vmem:[%s3348_s19 + $0x68] sm:$0xff] }
  0xee   : > { %v534_v42 = vmul.f32 0.088388346, %v518_v40  ;;  %v535_v43 = vmul.f32 0.088388346, %v519_v41  ;;  %v521_v45 = vld [vmem:[%s3348_s19 + $0x70] sm:$0xff]  ;;  %v522_v48 = vld [vmem:[%s3348_s19 + $0x78] sm:$0xff] }
  0xef   : > { %v536_v46 = vmul.f32 0.088388346, %v520_v44  ;;  %v537_v47 = vmul.f32 0.088388346, %v521_v45  ;;  %v538_v49 = vmul.f32 0.088388346, %v522_v48 }
  0xf0   : > { %2293 = vmatpush3.xpose.msra.mxu0 %v551_v7  ;;  %v716_v51 = vld [vmem:[%s3365_s24] sm:$0xff]  ;;  %v717_v54 = vld [vmem:[%s3365_s24 + $0x8] sm:$0xff]  ;;  %v718_v61 = vld [vmem:[%s3365_s24 + $0x10] sm:$0xff] }
  0xf1   : > { %2294 = vmatprep.subr.mxu0 %v550_v8  ;;  %vm720_vm1 = vnez %v716_v51  ;;  %vm721_vm2 = vnez %v717_v54  ;;  %vm722_vm3 = vnez %v718_v61 }
  0xf2   : > { %v724_v52 = vsel %vm720_vm1, 16843009, %v2992_v50  ;;  %v725_v59 = vsel %vm721_vm2, 16843009, %v2992_v50 }
  0xf3   : > { %v728_v53 = vunpack.c.0.s8 %v724_v52  ;;  %v731_v55 = vunpack.c.3.s8 %v724_v52  ;;  %v729_v57 = vunpack.c.1.s8 %v724_v52  ;;  %v730_v58 = vunpack.c.2.s8 %v724_v52  ;;  %v568_v52 = vld [vmem:[%s3363_s4 + $0x68] sm:$0xff] }
  0xf4   : > { %2295 = vmatpush3.xpose.msra.mxu0 %v550_v8  ;;  %v733_v1 = vunpack.c.1.s8 %v725_v59  ;;  %v732_v2 = vunpack.c.0.s8 %v725_v59  ;;  %v735_v7 = vunpack.c.3.s8 %v725_v59 }
  0xf5   : > { %2296 = vmatprep.subr.mxu0 %v549_v9  ;;  %v744_v56 = vpack.c.b16 %v728_v53, %v728_v53  ;;  %v750_v60 = vpack.c.b16 %v731_v55, %v731_v55  ;;  %v746_v63 = vpack.c.b16 %v729_v57, %v729_v57  ;;  %v748_v0 = vpack.c.b16 %v730_v58, %v730_v58 }
  0xf6   : > { %v754_v6 = vpack.c.b16 %v733_v1, %v733_v1  ;;  %v752_v8 = vpack.c.b16 %v732_v2, %v732_v2 }
  0xf7   : > { %v745_v62 = vpack.c.b8 %v744_v56, %v744_v56  ;;  %v751_v3 = vpack.c.b8 %v750_v60, %v750_v60  ;;  %v747_v4 = vpack.c.b8 %v746_v63, %v746_v63  ;;  %v749_v5 = vpack.c.b8 %v748_v0, %v748_v0 }
  0xf8   : > { %2297 = vmatpush3.xpose.msra.mxu0 %v549_v9  ;;  %v726_v9 = vsel %vm722_vm3, 16843009, %v2992_v50 }
  0xf9   : > { %2298 = vmatprep.subr.mxu0 %v548_v10  ;;  %vm776_vm4 = vnez %v745_v62  ;;  %vm779_vm5 = vnez %v751_v3  ;;  %vm777_vm6 = vnez %v747_v4  ;;  %vm778_vm7 = vnez %v749_v5 }
  0xfa   : > { %v793_v20 = vsel %vm777_vm6, 16843009, %v2992_v50  ;;  %v739_v24 = vunpack.c.3.s8 %v726_v9 }
  0xfc   : > { %2299 = vmatpush3.xpose.msra.mxu0 %v548_v10  ;;  %v734_v10 = vunpack.c.2.s8 %v725_v59  ;;  %v766_v36 = vpack.c.b16 %v739_v24, %v739_v24 }
  0xfd   : > { %2300 = vmatprep.subr.mxu0 %v547_v11 }
  0xfe   : > { %v767_v53 = vpack.c.b8 %v766_v36, %v766_v36 }
 0x100   : > { %2301 = vmatpush3.xpose.msra.mxu0 %v547_v11  ;;  %v792_v11 = vsel %vm776_vm4, 16843009, %v2992_v50 }
 0x101   : > { %2302 = vmatprep.subr.mxu0 %v546_v12  ;;  %v808_v21 = vunpack.c.0.s8 %v792_v11 }
 0x103   : > { %vm824_vm11 = vcmp.ne.s32.totalorder %v808_v21, 0 }
 0x104   : > { %2303 = vmatpush3.xpose.msra.mxu0 %v546_v12  ;;  %v737_v12 = vunpack.c.1.s8 %v726_v9 }
 0x105   : > { %2304 = vmatprep.subr.mxu0 %v545_v13 }
 0x108   : > { %2305 = vmatpush3.xpose.msra.mxu0 %v545_v13  ;;  %v719_v13 = vld [vmem:[%s3365_s24 + $0x18] sm:$0xff] }
 0x109   : > { %2306 = vmatprep.subr.mxu0 %v544_v14  ;;  %vm723_vm8 = vnez %v719_v13 }
 0x10a   : > { %v727_v28 = vsel %vm723_vm8, 16843009, %v2992_v50 }
 0x10b   : > { %v743_v57 = vunpack.c.3.s8 %v727_v28  ;;  %v742_v61 = vunpack.c.2.s8 %v727_v28 }
 0x10c   : > { %2307 = vmatpush3.xpose.msra.mxu0 %v544_v14  ;;  %v755_v14 = vpack.c.b8 %v754_v6, %v754_v6 }
 0x10d   : > { %2308 = vmatprep.subr.mxu0 %v543_v15 }
 0x10e   : > { %vm781_vm9 = vnez %v755_v14 }
 0x110   : > { %2309 = vmatpush3.xpose.msra.mxu0 %v543_v15  ;;  %v758_v15 = vpack.c.b16 %v735_v7, %v735_v7 }
 0x111   : > { %2310 = vmatprep.subr.mxu0 %v542_v16 }
 0x114   : > { %2311 = vmatpush3.xpose.msra.mxu0 %v542_v16  ;;  %v753_v16 = vpack.c.b8 %v752_v8, %v752_v8  ;;  %v774_v8 = vpack.c.b16 %v743_v57, %v743_v57  ;;  %v565_v57 = vld [vmem:[%s3363_s4 + $0x50] sm:$0xff] }
 0x115   : > { %2312 = vmatprep.subr.mxu0 %v541_v17 }
 0x116   : > { %vm780_vm10 = vnez %v753_v16 }
 0x118   : > { %2313 = vmatpush3.xpose.msra.mxu0 %v541_v17  ;;  %v795_v17 = vsel %vm779_vm5, 16843009, %v2992_v50  ;;  %vm3591_vm5 = vnez %v767_v53  ;;  %v567_v53 = vld [vmem:[%s3363_s4 + $0x60] sm:$0xff] }
 0x119   : > { %2314 = vmatprep.subr.mxu0 %v540_v18  ;;  %v811_v25 = vunpack.c.0.s8 %v795_v17  ;;  %v803_v16 = vsel %vm3591_vm5, 16843009, %v2992_v50  ;;  %vm1176_vm5 = vcmask 7168  }
 0x11a   : > { %v819_v24 = vunpack.c.0.s8 %v803_v16  ;;  %v560_v16 = vld [vmem:[%s3363_s4 + $0x28] sm:$0xff] }
 0x11b   : > { %vm3552_vm12 = vcmp.ne.s32.totalorder %v811_v25, 0 }
 0x11c   : > { %2315 = vmatpush3.xpose.msra.mxu0 %v540_v18  ;;  %v756_v18 = vpack.c.b16 %v734_v10, %v734_v10  ;;  %v772_v10 = vpack.c.b16 %v742_v61, %v742_v61 }
 0x11d   : > { %2316 = vmatprep.subr.mxu0 %v539_v19 }
 0x120   : > { %2317 = vmatpush3.xpose.msra.mxu0 %v539_v19  ;;  %v736_v19 = vunpack.c.0.s8 %v726_v9 }
 0x122   : > { %v760_v29 = vpack.c.b16 %v736_v19, %v736_v19  ;;  %v775_v19 = vpack.c.b8 %v774_v8, %v774_v8 }
 0x123   : > { %2319 = vmatmul.mubr.f32.vlgmr.msra.gmra.mxu0 %v524_v22  ;;  %v794_v22 = vsel %vm778_vm7, 16843009, %v2992_v50 }
 0x124   : > { %2321 = vmatprep.mubr.f32.mxu0 %v525_v23  ;;  %v762_v23 = vpack.c.b16 %v737_v12, %v737_v12  ;;  %v810_v32 = vunpack.c.0.s8 %v794_v22  ;;  %v761_v41 = vpack.c.b8 %v760_v29, %v760_v29 }
 0x126   : > { %vm3563_vm0 = vcmp.ne.s32.totalorder %v810_v32, 0  ;;  %vm784_vm2 = vnez %v761_v41 }
 0x127   : > { %2322 = vmatmul.mubr.f32.gmra.mxu0 %v526_v26  ;;  %v759_v26 = vpack.c.b8 %v758_v15, %v758_v15  ;;  %v800_v6 = vsel %vm784_vm2, 16843009, %v2992_v50 }
 0x128   : > { %2324 = vmatprep.mubr.f32.mxu0 %v527_v27  ;;  %v757_v27 = vpack.c.b8 %v756_v18, %v756_v18  ;;  %v816_v15 = vunpack.c.0.s8 %v800_v6  ;;  %v562_v6 = vld [vmem:[%s3363_s4 + $0x38] sm:$0xff] }
 0x129   : > { %vm783_vm13 = vnez %v759_v26 }
 0x12a   : > { %vm782_vm14 = vnez %v757_v27 }
 0x12b   : > { %2325 = vmatmul.mubr.f32.gmra.mxu0 %v528_v30  ;;  %v738_v30 = vunpack.c.2.s8 %v726_v9  ;;  %v798_v55 = vsel %vm782_vm14, 16843009, %v2992_v50 }
 0x12c   : > { %2327 = vmatprep.mubr.f32.mxu0 %v529_v31  ;;  %v809_v31 = vunpack.c.0.s8 %v793_v20  ;;  %v814_v2 = vunpack.c.0.s8 %v798_v55  ;;  %v773_v20 = vpack.c.b8 %v772_v10, %v772_v10  ;;  %v566_v55 = vld [vmem:[%s3363_s4 + $0x58] sm:$0xff]  ;;  %v561_v10 = vld [vmem:[%s3363_s4 + $0x30] sm:$0xff] }
 0x12e   : > { %vm3559_vm15 = vcmp.ne.s32.totalorder %v809_v31, 0  ;;  %vm830_vm8 = vcmp.ne.s32.totalorder %v814_v2, 0  ;;  %vm790_vm14 = vnez %v773_v20  ;;  %v563_v2 = vld [vmem:[%s3363_s4 + $0x40] sm:$0xff] }
 0x12f   : > { %2328 = vmatmul.mubr.f32.gmra.mxu0 %v530_v34  ;;  %v797_v34 = vsel %vm781_vm9, 16843009, %v2992_v50  ;;  %v559_v20 = vld [vmem:[%s3363_s4 + $0x20] sm:$0xff] }
 0x130   : > { %2330 = vmatprep.mubr.f32.mxu0 %v531_v35  ;;  %v763_v35 = vpack.c.b8 %v762_v23, %v762_v23 }
 0x132   : > { %vm3569_vm1 = vnez %v763_v35  ;;  %v806_v35 = vsel %vm790_vm14, 16843009, %v2992_v50 }
 0x133   : > { %2331 = vmatmul.mubr.f32.gmra.mxu0 %v532_v38  ;;  %v796_v38 = vsel %vm780_vm10, 16843009, %v2992_v50  ;;  %v801_v3 = vsel %vm3569_vm1, 16843009, %v2992_v50  ;;  %v822_v41 = vunpack.c.0.s8 %v806_v35  ;;  %v3712_v35 = vld [vmem:[#allocation2 + $0x48] sm:$0xff] }
 0x134   : > { %2333 = vmatprep.mubr.f32.mxu0 %v533_v39  ;;  %v741_v39 = vunpack.c.1.s8 %v727_v28  ;;  %v812_v51 = vunpack.c.0.s8 %v796_v38  ;;  %v817_v14 = vunpack.c.0.s8 %v801_v3 }
 0x136   : > { %v770_v56 = vpack.c.b16 %v741_v39, %v741_v39  ;;  %vm828_vm4 = vcmp.ne.s32.totalorder %v812_v51, 0  ;;  %v569_v51 = vld [vmem:[%s3363_s4 + $0x70] sm:$0xff] }
 0x137   : > { %2334 = vmatmul.mubr.f32.gmra.mxu0 %v534_v42  ;;  %v764_v42 = vpack.c.b16 %v738_v30, %v738_v30 }
 0x138   : > { %2336 = vmatprep.mubr.f32.mxu0 %v535_v43  ;;  %v740_v43 = vunpack.c.0.s8 %v727_v28  ;;  %v771_v5 = vpack.c.b8 %v770_v56, %v770_v56  ;;  %v3646_v56 = vld [vmem:[#allocation2] sm:$0xff] }
 0x139   : > { %v765_v59 = vpack.c.b8 %v764_v42, %v764_v42 }
 0x13a   : > { %v768_v60 = vpack.c.b16 %v740_v43, %v740_v43  ;;  %vm789_vm9 = vnez %v771_v5  ;;  %v3664_v5 = vld [vmem:[#allocation2 + $0x10] sm:$0xff] }
 0x13b   : > { %2337 = vmatmul.mubr.f32.gmra.mxu0 %v536_v46  ;;  %vm786_vm6 = vnez %v765_v59  ;;  %v805_v26 = vsel %vm789_vm9, 16843009, %v2992_v50  ;;  %v3649_v59 = vld [vmem:[#allocation2 + $0x18] sm:$0xff] }
 0x13c   : > { %2339 = vmatprep.mubr.f32.mxu0 %v537_v47  ;;  %v813_v47 = vunpack.c.0.s8 %v797_v34  ;;  %v769_v9 = vpack.c.b8 %v768_v60, %v768_v60  ;;  %v802_v17 = vsel %vm786_vm6, 16843009, %v2992_v50  ;;  %v821_v32 = vunpack.c.0.s8 %v805_v26  ;;  %v564_v60 = vld [vmem:[%s3363_s4 + $0x48] sm:$0xff]  ;;  %v558_v26 = vld [vmem:[%s3363_s4 + $0x18] sm:$0xff] }
 0x13d   : > { %v818_v25 = vunpack.c.0.s8 %v802_v17 }
 0x13e   : > { %vm829_vm3 = vcmp.ne.s32.totalorder %v813_v47, 0  ;;  %vm788_vm10 = vnez %v769_v9  ;;  %vm837_vm1 = vcmp.ne.s32.totalorder %v821_v32, 0  ;;  %v3672_v9 = vld [vmem:[#allocation2 + $0x20] sm:$0xff]  ;;  %v557_v32 = vld [vmem:[%s3363_s4 + $0x10] sm:$0xff] }
 0x13f   : > { %2340 = vmatmul.mubr.f32.gmra.mxu0 %v538_v49  ;;  %v799_v49 = vsel %vm783_vm13, 16843009, %v2992_v50  ;;  %v804_v27 = vsel %vm788_vm10, 16843009, %v2992_v50  ;;  %vm791_vm13 = vnez %v775_v19  ;;  %v3689_v19 = vld [vmem:[#allocation2 + $0x30] sm:$0xff] }
 0x140   : > { %v815_v1 = vunpack.c.0.s8 %v799_v49  ;;  %v807_v34 = vsel %vm791_vm13, 16843009, %v2992_v50  ;;  %v570_v49 = vld [vmem:[%s3363_s4 + $0x78] sm:$0xff] }
 0x141   : > { %2342 = vmatprep.subr.mxu1 %v570_v49 }
 0x142   : > { %vm831_vm7 = vcmp.ne.s32.totalorder %v815_v1, 0  ;;  %2343 = vmatpush3.msra.mxu1 %v570_v49  ;;  %v3655_v1 = vld [vmem:[#allocation2 + $0x8] sm:$0xff] }
 0x143   : > { %2344 = vmatprep.subr.mxu1 %v569_v51 }
 0x144   : > { %2345 = vmatpush3.msra.mxu1 %v569_v51 }
 0x145   : > { %2346 = vmatprep.subr.mxu1 %v568_v52 }
 0x146   : > { %2347 = vmatpush3.msra.mxu1 %v568_v52  ;;  %v867_v52 = vld [vmem:[#allocation2 + $0x58] sm:$0xff] }
 0x147   : > { %2348 = vmatprep.subr.mxu1 %v567_v53 }
 0x148   : > { %2349 = vmatpush3.msra.mxu1 %v567_v53 }
 0x149   : > { %2350 = vmatprep.subr.mxu1 %v566_v55 }
 0x14a   : > { %2351 = vmatpush3.msra.mxu1 %v566_v55 }
 0x14b   : > { %2352 = vmatprep.subr.mxu1 %v565_v57 }
 0x14c   : > { %2353 = vmatpush3.msra.mxu1 %v565_v57 }
 0x14d   : > { %2354 = vmatprep.subr.mxu1 %v564_v60 }
 0x14e   : > { %2355 = vmatpush3.msra.mxu1 %v564_v60 }
 0x14f   : > { %2356 = vmatprep.subr.mxu1 %v563_v2 }
 0x150   : > { %2357 = vmatpush3.msra.mxu1 %v563_v2 }
 0x151   : > { %2358 = vmatprep.subr.mxu1 %v562_v6 }
 0x152   : > { %2359 = vmatpush3.msra.mxu1 %v562_v6  ;;  %v3741_v6 = vld [vmem:[#allocation2 + $0x70] sm:$0xff] }
 0x153   : > { %2360 = vmatprep.subr.mxu1 %v561_v10 }
 0x154   : > { %2361 = vmatpush3.msra.mxu1 %v561_v10 }
 0x155   : > { %2362 = vmatprep.subr.mxu1 %v560_v16 }
 0x156   : > { %2363 = vmatpush3.msra.mxu1 %v560_v16 }
 0x157   : > { %2364 = vmatprep.subr.mxu1 %v559_v20 }
 0x158   : > { %2365 = vmatpush3.msra.mxu1 %v559_v20 }
 0x159   : > { %2366 = vmatprep.subr.mxu1 %v558_v26 }
 0x15a   : > { %2367 = vmatpush3.msra.mxu1 %v558_v26 }
 0x15b   : > { %2368 = vmatprep.subr.mxu1 %v557_v32 }
 0x15c   : > { %2369 = vmatpush3.msra.mxu1 %v557_v32 }
 0x1e3   : > { %v2320_v33 = vpop.f32.mrf.mxu0 }
 0x1e4   : > { %v3581_v62 = vsel %vm3559_vm15, -1e+18, %v2320_v33  ;;  %vm835_vm15 = vcmp.ne.s32.totalorder %v819_v24, 0  ;;  %v820_v33 = vunpack.c.0.s8 %v804_v27  ;;  %v3696_v24 = vld [vmem:[#allocation2 + $0x38] sm:$0xff] }
 0x1e5   : > { %v637_v40 = vpop.f32.mrf.mxu0 }
 0x1e6   : > { %v3557_v44 = vsel %vm824_vm11, -1e+18, %v637_v40  ;;  %vm833_vm11 = vcmp.ne.s32.totalorder %v817_v14, 0  ;;  %v823_v40 = vunpack.c.0.s8 %v807_v34  ;;  %vm836_vm2 = vcmp.ne.s32.totalorder %v820_v33, 0  ;;  %v3681_v14 = vld [vmem:[#allocation2 + $0x28] sm:$0xff] }
 0x1e7   : > { %872 = vmax.xlane.f32.xlu0 %v3557_v44  ;;  %v2323_v48 = vpop.f32.mrf.mxu0 }
 0x1e8   : > { %v3575_v54 = vsel %vm3552_vm12, -1e+18, %v2323_v48  ;;  %vm832_vm12 = vcmp.ne.s32.totalorder %v816_v15, 0 }
 0x1e9   : > { %878 = vmax.xlane.f32.xlu1 %v3575_v54  ;;  %v647_v58 = vpop.f32.mrf.mxu0 }
 0x1ea   : > { %v3585_v63 = vsel %vm3563_vm0, -1e+18, %v647_v58  ;;  %vm834_vm0 = vcmp.ne.s32.totalorder %v818_v25, 0 }
 0x1eb   : > { %874 = vmax.xlane.f32.xlu0 %v3581_v62  ;;  %v2326_v0 = vpop.f32.mrf.mxu0 }
 0x1ec   : > { %v3597_v11 = vsel %vm829_vm3, -1e+18, %v2326_v0  ;;  %vm839_vm3 = vcmp.ne.s32.totalorder %v823_v40, 0 }
 0x1ed   : > { %876 = vmax.xlane.f32.xlu1 %v3585_v63  ;;  %v657_v7 = vpop.f32.mrf.mxu0 }
 0x1ee   : > { %v3599_v12 = vsel %vm828_vm4, -1e+18, %v657_v7  ;;  %vm838_vm4 = vcmp.ne.s32.totalorder %v822_v41, 0 }
 0x1ef   : > { %v2329_v13 = vpop.f32.mrf.mxu0  ;;  %880 = vmax.xlane.f32.xlu0 %v3599_v12 }
 0x1f0   : > { %v3607_v21 = vsel %vm831_vm7, -1e+18, %v2329_v13 }
 0x1f1   : > { %882 = vmax.xlane.f32.xlu1 %v3597_v11  ;;  %v667_v18 = vpop.f32.mrf.mxu0 }
 0x1f2   : > { %v3609_v22 = vsel %vm830_vm8, -1e+18, %v667_v18 }
 0x1f3   : > { %v2332_v23 = vpop.f32.mrf.mxu0  ;;  %884 = vmax.xlane.f32.xlu0 %v3609_v22 }
 0x1f4   : > { %v3615_v29 = vsel %vm833_vm11, -1e+18, %v2332_v23 }
 0x1f5   : > { %886 = vmax.xlane.f32.xlu1 %v3607_v21  ;;  %v677_v28 = vpop.f32.mrf.mxu0 }
 0x1f6   : > { %v3617_v30 = vsel %vm832_vm12, -1e+18, %v677_v28 }
 0x1f7   : > { %v2335_v31 = vpop.f32.mrf.mxu0  ;;  %888 = vmax.xlane.f32.xlu0 %v3617_v30 }
 0x1f8   : > { %v3623_v37 = vsel %vm835_vm15, -1e+18, %v2335_v31  ;;  %v3703_v31 = vld [vmem:[#allocation2 + $0x40] sm:$0xff] }
 0x1f9   : > { %890 = vmax.xlane.f32.xlu1 %v3615_v29  ;;  %v687_v36 = vpop.f32.mrf.mxu0 }
 0x1fa   : > { %v3625_v38 = vsel %vm834_vm0, -1e+18, %v687_v36 }
 0x1fb   : > { %v2338_v39 = vpop.f32.mrf.mxu0  ;;  %892 = vmax.xlane.f32.xlu0 %v3625_v38 }
 0x1fc   : > { %v3629_v50 = vsel %vm837_vm1, -1e+18, %v2338_v39  ;;  %v556_v39 = vld [vmem:[%s3363_s4 + $0x8] sm:$0xff] }
 0x1fd   : > { %894 = vmax.xlane.f32.xlu1 %v3623_v37  ;;  %v697_v42 = vpop.f32.mrf.mxu0  ;;  %2370 = vmatprep.subr.mxu1 %v556_v39 }
 0x1fe   : > { %v3631_v43 = vsel %vm836_vm2, -1e+18, %v697_v42  ;;  %v3719_v42 = vld [vmem:[#allocation2 + $0x50] sm:$0xff]  ;;  %2371 = vmatpush3.msra.mxu1 %v556_v39 }
 0x1ff   : > { %v2341_v45 = vpop.f32.mrf.mxu0  ;;  %896 = vmax.xlane.f32.xlu0 %v3631_v43 }
 0x200   : > { %v3635_v47 = vsel %vm839_vm3, -1e+18, %v2341_v45  ;;  %v555_v45 = vld [vmem:[%s3363_s4] sm:$0xff] }
 0x201   : > { %898 = vmax.xlane.f32.xlu1 %v3629_v50  ;;  %v707_v46 = vpop.f32.mrf.mxu0  ;;  %2372 = vmatprep.subr.mxu1 %v555_v45 }
 0x202   : > { %v3637_v48 = vsel %vm838_vm4, -1e+18, %v707_v46  ;;  %2373 = vmatpush3.msra.mxu1 %v555_v45 }
 0x203   : > { %900 = vmax.xlane.f32.xlu0 %v3637_v48 }
 0x205   : > { %902 = vmax.xlane.f32.xlu1 %v3635_v47 }
 0x270   : > { %v873_v58 = vpop.xlane.xlu0 %872 }
 0x271   : > { %v3653_v61 = vmax.f32 %v3646_v56, %v873_v58  ;;  %v3732_v58 = vld [vmem:[#allocation2 + $0x60] sm:$0xff] }
 0x272   : > { %v879_v0 = vpop.xlane.xlu1 %878 }
 0x273   : > { %1482 = vst.msk [vmem:[#allocation2] sm:$0xff] %vm1176_vm5, %v3653_v61  ;;  %v3661_v3 = vmax.f32 %v3649_v59, %v879_v0  ;;  %970 = vperm.xlu0 %2571, %v3653_v61   ;;  %v920_v33 = vsub.f32 %v3646_v56, %v3653_v61  ;;  %v869_v61 = vld [vmem:[#allocation2 + $0x68] sm:$0xff] }
 0x274   : > { %v875_v4 = vpop.xlane.xlu0 %874 }
 0x275   : > { %1485 = vst.msk [vmem:[#allocation2 + $0x18] sm:$0xff] %vm1176_vm5, %v3661_v3  ;;  %v3670_v7 = vmax.f32 %v3655_v1, %v875_v4  ;;  %v936_v46 = vmul.f32 1.442695, %v920_v33  ;;  %v923_v49 = vsub.f32 %v3649_v59, %v3661_v3 }
 0x276   : > { %v877_v8 = vpop.xlane.xlu1 %876 }
 0x277   : > { %1483 = vst.msk [vmem:[#allocation2 + $0x8] sm:$0xff] %vm1176_vm5, %v3670_v7  ;;  %v3678_v13 = vmax.f32 %v3664_v5, %v877_v8  ;;  %975 = vperm.xlu1 %2572, %v3670_v7   ;;  %2573 = vpow2.f32 %v936_v46  ;;  %v942_v59 = vmul.f32 1.442695, %v923_v49  ;;  %v921_v16 = vsub.f32 %v3655_v1, %v3670_v7 }
 0x278   : > { %v881_v15 = vpop.xlane.xlu0 %880 }
 0x279   : > { %1484 = vst.msk [vmem:[#allocation2 + $0x10] sm:$0xff] %vm1176_vm5, %v3678_v13  ;;  %v3687_v17 = vmax.f32 %v3672_v9, %v881_v15  ;;  %2575 = vpow2.f32 %v942_v59  ;;  %v938_v1 = vmul.f32 1.442695, %v921_v16  ;;  %v922_v7 = vsub.f32 %v3664_v5, %v3678_v13 }
 0x27a   : > { %v883_v18 = vpop.xlane.xlu1 %882 }
 0x27b   : > { %v909_v23 = vmax.f32 %v3681_v14, %v883_v18  ;;  %985 = vperm.xlu1 %2572, %v3661_v3   ;;  %1486 = vst.msk [vmem:[#allocation2 + $0x20] sm:$0xff] %vm1176_vm5, %v3687_v17  ;;  %v924_v5 = vsub.f32 %v3672_v9, %v3687_v17 }
 0x27c   : > { %v885_v25 = vpop.xlane.xlu0 %884 }
 0x27d   : > { %1487 = vst.msk [vmem:[#allocation2 + $0x28] sm:$0xff] %vm1176_vm5, %v909_v23  ;;  %v3701_v27 = vmax.f32 %v3689_v19, %v885_v25  ;;  %v925_v56 = vsub.f32 %v3681_v14, %v909_v23  ;;  %v3746_v14 = vld [vmem:[#allocation2 + $0x78] sm:$0xff] }
 0x27e   : > { %v887_v28 = vpop.xlane.xlu1 %886 }
 0x27f   : > { %v911_v34 = vmax.f32 %v3696_v24, %v887_v28  ;;  %980 = vperm.xlu1 %2572, %v3678_v13   ;;  %1488 = vst.msk [vmem:[#allocation2 + $0x30] sm:$0xff] %vm1176_vm5, %v3701_v27  ;;  %v946_v3 = vmul.f32 1.442695, %v925_v56  ;;  %v926_v45 = vsub.f32 %v3689_v19, %v3701_v27 }
 0x280   : > { %v889_v36 = vpop.xlane.xlu0 %888 }
 0x281   : > { %1489 = vst.msk [vmem:[#allocation2 + $0x38] sm:$0xff] %vm1176_vm5, %v911_v34  ;;  %v3717_v40 = vmax.f32 %v3703_v31, %v889_v36  ;;  %v927_v8 = vsub.f32 %v3696_v24, %v911_v34  ;;  %2577 = vpow2.f32 %v946_v3 }
 0x282   : > { %v891_v41 = vpop.xlane.xlu1 %890 }
 0x283   : > { %v913_v51 = vmax.f32 %v3712_v35, %v891_v41  ;;  %995 = vperm.xlu1 %2572, %v909_v23   ;;  %1490 = vst.msk [vmem:[#allocation2 + $0x40] sm:$0xff] %vm1176_vm5, %v3717_v40  ;;  %v950_v23 = vmul.f32 1.442695, %v927_v8  ;;  %v944_v41 = vmul.f32 1.442695, %v924_v5  ;;  %v928_v49 = vsub.f32 %v3703_v31, %v3717_v40 }
 0x284   : > { %v893_v53 = vpop.xlane.xlu0 %892 }
 0x285   : > { %1491 = vst.msk [vmem:[#allocation2 + $0x48] sm:$0xff] %vm1176_vm5, %v913_v51  ;;  %1015 = vperm.xlu0 %2571, %v913_v51   ;;  %v3729_v55 = vmax.f32 %v3719_v42, %v893_v53  ;;  %v929_v24 = vsub.f32 %v3712_v35, %v913_v51  ;;  %2579 = vpow2.f32 %v950_v23  ;;  %v940_v35 = vmul.f32 1.442695, %v922_v7 }
 0x286   : > { %v895_v57 = vpop.xlane.xlu1 %894  ;;  %2581 = vpow2.f32 %v938_v1  ;;  %v952_v19 = vmul.f32 1.442695, %v928_v49 }
 0x287   : > { %v915_v60 = vmax.f32 %v867_v52, %v895_v57  ;;  %990 = vperm.xlu1 %2572, %v3687_v17   ;;  %1492 = vst.msk [vmem:[#allocation2 + $0x50] sm:$0xff] %vm1176_vm5, %v3729_v55  ;;  %v954_v32 = vmul.f32 1.442695, %v929_v24  ;;  %v948_v17 = vmul.f32 1.442695, %v926_v45 }
 0x288   : > { %v897_v0 = vpop.xlane.xlu0 %896 }
 0x289   : > { %1493 = vst.msk [vmem:[#allocation2 + $0x58] sm:$0xff] %vm1176_vm5, %v915_v60  ;;  %1025 = vperm.xlu0 %2571, %v915_v60   ;;  %v3739_v2 = vmax.f32 %v3732_v58, %v897_v0  ;;  %v931_v33 = vsub.f32 %v867_v52, %v915_v60  ;;  %2583 = vpow2.f32 %v954_v32 }
 0x28a   : > { %v899_v4 = vpop.xlane.xlu1 %898  ;;  %2585 = vpow2.f32 %v940_v35 }
 0x28b   : > { %v917_v10 = vmax.f32 %v869_v61, %v899_v4  ;;  %1005 = vperm.xlu1 %2572, %v911_v34   ;;  %1494 = vst.msk [vmem:[#allocation2 + $0x60] sm:$0xff] %vm1176_vm5, %v3739_v2  ;;  %v3771_v34 = vpop.eup %2573  ;;  %v958_v13 = vmul.f32 1.442695, %v931_v33 }
 0x28c   : > { %v901_v15 = vpop.xlane.xlu0 %900  ;;  %v3777_v39 = vpop.eup %2575 }
 0x28d   : > { %1495 = vst.msk [vmem:[#allocation2 + $0x68] sm:$0xff] %vm1176_vm5, %v917_v10  ;;  %1035 = vperm.xlu0 %2571, %v917_v10   ;;  %v3752_v18 = vmax.f32 %v3741_v6, %v901_v15  ;;  %v933_v36 = vsub.f32 %v869_v61, %v917_v10  ;;  %2587 = vpow2.f32 %v958_v13 }
 0x28e   : > { %v903_v20 = vpop.xlane.xlu1 %902  ;;  %v3782_v46 = vpop.eup %2577  ;;  %2589 = vpow2.f32 %v944_v41 }
 0x28f   : > { %v3756_v25 = vmax.f32 %v3746_v14, %v903_v20  ;;  %1000 = vperm.xlu1 %2572, %v3701_v27   ;;  %v934_v26 = vsub.f32 %v3741_v6, %v3752_v18  ;;  %1496 = vst.msk [vmem:[#allocation2 + $0x70] sm:$0xff] %vm1176_vm5, %v3752_v18  ;;  %v962_v9 = vmul.f32 1.442695, %v933_v36  ;;  %v930_v27 = vsub.f32 %v3719_v42, %v3729_v55 }
 0x291   : > { %v935_v28 = vsub.f32 %v3746_v14, %v3756_v25  ;;  %1497 = vst.msk [vmem:[#allocation2 + $0x78] sm:$0xff] %vm1176_vm5, %v3756_v25  ;;  %1045 = vperm.xlu0 %2571, %v3756_v25   ;;  %2591 = vpow2.f32 %v962_v9  ;;  %v956_v31 = vmul.f32 1.442695, %v930_v27 }
 0x292   : > { %v3789_v51 = vpop.eup %2579  ;;  %2593 = vpow2.f32 %v948_v17 }
 0x293   : > { %1010 = vperm.xlu1 %2572, %v3717_v40   ;;  %v3794_v52 = vpop.eup %2581  ;;  %2595 = vpow2.f32 %v952_v19  ;;  %v932_v40 = vsub.f32 %v3732_v58, %v3739_v2  ;;  %v966_v6 = vmul.f32 1.442695, %v935_v28 }
 0x294   : > { %2597 = vpow2.f32 %v956_v31 }
 0x295   : > { %1211 = vperm.xlu0 %2571, %v3771_v34  }
 0x296   : > { %v3797_v53 = vpop.eup %2583 }
 0x297   : > { %1020 = vperm.xlu1 %2572, %v3729_v55   ;;  %v3802_v56 = vpop.eup %2585  ;;  %v960_v55 = vmul.f32 1.442695, %v932_v40 }
 0x299   : > { %1226 = vperm.xlu0 %2571, %v3777_v39   ;;  %2599 = vpow2.f32 %v960_v55 }
 0x29a   : > { %v3805_v42 = vpop.eup %2587 }
 0x29b   : > { %1030 = vperm.xlu1 %2572, %v3739_v2   ;;  %v3808_v57 = vpop.eup %2589 }
 0x29d   : > { %1236 = vperm.xlu0 %2571, %v3782_v46  }
 0x29e   : > { %v3811_v59 = vpop.eup %2591 }
 0x29f   : > { %1040 = vperm.xlu1 %2572, %v3752_v18   ;;  %v3814_v58 = vpop.eup %2593 }
 0x2a0   : > { %v3817_v60 = vpop.eup %2595 }
 0x2a1   : > { %1246 = vperm.xlu0 %2571, %v3789_v51   ;;  %v3820_v61 = vpop.eup %2597 }
 0x2a3   : > { %1216 = vperm.xlu1 %2572, %v3794_v52  }
 0x2a5   : > { %1256 = vperm.xlu0 %2571, %v3797_v53  }
 0x2a6   : > { %v3823_v0 = vpop.eup %2599 }
 0x2a7   : > { %1221 = vperm.xlu1 %2572, %v3802_v56  }
 0x2a9   : > { %1266 = vperm.xlu0 %2571, %v3805_v42  }
 0x2ab   : > { %1231 = vperm.xlu1 %2572, %v3808_v57  }
 0x2ad   : > { %1276 = vperm.xlu0 %2571, %v3811_v59  }
 0x2af   : > { %1241 = vperm.xlu1 %2572, %v3814_v58  }
 0x2b3   : > { %1251 = vperm.xlu1 %2572, %v3817_v60  }
 0x2b7   : > { %1261 = vperm.xlu1 %2572, %v3820_v61  }
 0x2bb   : > { %1271 = vperm.xlu1 %2572, %v3823_v0  }
 0x2ee   : > { %v971_v2 = vpop.permute.xlu0 %970 }
 0x2ef   : > { %v1048_v3 = vsub.f32 %v3557_v44, %v971_v2 }
 0x2f1   : > { %v1064_v4 = vmul.f32 1.442695, %v1048_v3 }
 0x2f2   : > { %v976_v8 = vpop.permute.xlu1 %975 }
 0x2f3   : > { %2601 = vpow2.f32 %v1064_v4  ;;  %v1049_v10 = vsub.f32 %v3581_v62, %v976_v8 }
 0x2f5   : > { %v1066_v15 = vmul.f32 1.442695, %v1049_v10 }
 0x2f6   : > { %v986_v16 = vpop.permute.xlu1 %985 }
 0x2f7   : > { %2603 = vpow2.f32 %v1066_v15  ;;  %v1051_v20 = vsub.f32 %v3575_v54, %v986_v16 }
 0x2f9   : > { %v1070_v23 = vmul.f32 1.442695, %v1051_v20 }
 0x2fa   : > { %v981_v24 = vpop.permute.xlu1 %980 }
 0x2fb   : > { %2605 = vpow2.f32 %v1070_v23  ;;  %v1050_v1 = vsub.f32 %v3585_v63, %v981_v24 }
 0x2fd   : > { %v1068_v7 = vmul.f32 1.442695, %v1050_v1 }
 0x2fe   : > { %v996_v32 = vpop.permute.xlu1 %995 }
 0x2ff   : > { %2607 = vpow2.f32 %v1068_v7  ;;  %v1053_v44 = vsub.f32 %v3597_v11, %v996_v32 }
 0x300   : > { %v3831_v33 = vpop.eup %2601  ;;  %v1016_v35 = vpop.permute.xlu0 %1015 }
 0x301   : > { %v1074_v5 = vmul.f32 1.442695, %v1053_v44  ;;  %1128 = vadd.xlane.f32.xlu1 %v3831_v33  ;;  %2374 = vmatprep.mubr.f32.mxu1 %v3831_v33  ;;  %v1057_v9 = vsub.f32 %v3615_v29, %v1016_v35 }
 0x302   : > { %v991_v62 = vpop.permute.xlu1 %990 }
 0x303   : > { %2609 = vpow2.f32 %v1074_v5  ;;  %v1052_v54 = vsub.f32 %v3599_v12, %v991_v62  ;;  %v1082_v31 = vmul.f32 1.442695, %v1057_v9 }
 0x304   : > { %v3836_v13 = vpop.eup %2603  ;;  %v1026_v36 = vpop.permute.xlu0 %1025 }
 0x305   : > { %v1072_v63 = vmul.f32 1.442695, %v1052_v54  ;;  %1130 = vadd.xlane.f32.xlu0 %v3836_v13  ;;  %2375 = vmatmul.mubr.f32.vlgmr.msra.gmra.mxu1 %v3836_v13  ;;  %v1059_v40 = vsub.f32 %v3623_v37, %v1026_v36  ;;  %v964_v36 = vmul.f32 1.442695, %v934_v26 }
 0x306   : > { %v1006_v11 = vpop.permute.xlu1 %1005 }
 0x307   : > { %2611 = vpow2.f32 %v1072_v63  ;;  %v1055_v41 = vsub.f32 %v3607_v21, %v1006_v11 }
 0x308   : > { %v3841_v45 = vpop.eup %2605  ;;  %v1036_v49 = vpop.permute.xlu0 %1035 }
 0x309   : > { %v1078_v17 = vmul.f32 1.442695, %v1055_v41  ;;  %1134 = vadd.xlane.f32.xlu1 %v3841_v45  ;;  %v1061_v3 = vsub.f32 %v3629_v50, %v1036_v49 }
 0x30a   : > { %v1001_v12 = vpop.permute.xlu1 %1000 }
 0x30b   : > { %2613 = vpow2.f32 %v1078_v17  ;;  %v1054_v19 = vsub.f32 %v3609_v22, %v1001_v12  ;;  %v1086_v22 = vmul.f32 1.442695, %v1059_v40  ;;  %v1090_v16 = vmul.f32 1.442695, %v1061_v3 }
 0x30c   : > { %v3846_v27 = vpop.eup %2607  ;;  %v1046_v4 = vpop.permute.xlu0 %1045 }
 0x30d   : > { %v1076_v55 = vmul.f32 1.442695, %v1054_v19  ;;  %1132 = vadd.xlane.f32.xlu0 %v3846_v27  ;;  %2377 = vmatprep.mubr.f32.mxu1 %v3846_v27 }
 0x30e   : > { %v1011_v21 = vpop.permute.xlu1 %1010  ;;  %2378 = vmatmul.mubr.f32.gmra.mxu1 %v3841_v45 }
 0x30f   : > { %2615 = vpow2.f32 %v1076_v55  ;;  %v1056_v29 = vsub.f32 %v3617_v30, %v1011_v21  ;;  %v1063_v30 = vsub.f32 %v3635_v47, %v1046_v4 }
 0x310   : > { %v3853_v2 = vpop.eup %2609  ;;  %2617 = vpow2.f32 %v1082_v31  ;;  %v3920_v9 = vpop.permute.xlu0 %1211 }
 0x311   : > { %v1080_v8 = vmul.f32 1.442695, %v1056_v29  ;;  %1138 = vadd.xlane.f32.xlu1 %v3853_v2  ;;  %v1096_v29 = vld [vmem:[#allocation3] sm:$0xff] }
 0x312   : > { %v1021_v37 = vpop.permute.xlu1 %1020 }
 0x313   : > { %2619 = vpow2.f32 %v1080_v8  ;;  %v1058_v10 = vsub.f32 %v3625_v38, %v1021_v37  ;;  %v1094_v38 = vmul.f32 1.442695, %v1063_v30  ;;  %v1097_v8 = vld [vmem:[#allocation3 + $0x8] sm:$0xff]  ;;  %v1099_v30 = vld [vmem:[#allocation3 + $0x18] sm:$0xff] }
 0x314   : > { %v3858_v15 = vpop.eup %2611  ;;  %2621 = vpow2.f32 %v1086_v22  ;;  %v3924_v12 = vpop.permute.xlu0 %1226  ;;  %v1112_v22 = vmul.f32 %v3771_v34, %v1096_v29 }
 0x315   : > { %v1084_v20 = vmul.f32 1.442695, %v1058_v10  ;;  %1136 = vadd.xlane.f32.xlu0 %v3858_v15  ;;  %2380 = vmatprep.mubr.f32.mxu1 %v3858_v15  ;;  %v1113_v10 = vmul.f32 %v3794_v52, %v1097_v8 }
 0x316   : > { %v1031_v50 = vpop.permute.xlu1 %1030  ;;  %2381 = vmatmul.mubr.f32.gmra.mxu1 %v3853_v2 }
 0x317   : > { %2623 = vpow2.f32 %v1084_v20  ;;  %v1060_v23 = vsub.f32 %v3631_v43, %v1031_v50  ;;  %v1115_v50 = vmul.f32 %v3777_v39, %v1099_v30  ;;  %v1105_v30 = vld [vmem:[#allocation3 + $0x48] sm:$0xff] }
 0x318   : > { %v3865_v24 = vpop.eup %2613  ;;  %2625 = vpow2.f32 %v1090_v16  ;;  %v3928_v14 = vpop.permute.xlu0 %1236 }
 0x319   : > { %v1088_v1 = vmul.f32 1.442695, %v1060_v23  ;;  %1142 = vadd.xlane.f32.xlu1 %v3865_v24 }
 0x31a   : > { %v1041_v7 = vpop.permute.xlu1 %1040 }
 0x31b   : > { %2627 = vpow2.f32 %v1088_v1  ;;  %v1062_v47 = vsub.f32 %v3637_v48, %v1041_v7 }
 0x31c   : > { %v3869_v32 = vpop.eup %2615  ;;  %2629 = vpow2.f32 %v1094_v38  ;;  %v3932_v28 = vpop.permute.xlu0 %1246  ;;  %v1098_v38 = vld [vmem:[#allocation3 + $0x10] sm:$0xff] }
 0x31d   : > { %v3871_v44 = vpop.eup %2617  ;;  %v1092_v35 = vmul.f32 1.442695, %v1062_v47  ;;  %1140 = vadd.xlane.f32.xlu0 %v3869_v32  ;;  %2383 = vmatprep.mubr.f32.mxu1 %v3869_v32  ;;  %v1114_v34 = vmul.f32 %v3802_v56, %v1098_v38  ;;  %v1101_v47 = vld [vmem:[#allocation3 + $0x28] sm:$0xff] }
 0x31e   : > { %1146 = vadd.xlane.f32.xlu1 %v3871_v44  ;;  %2384 = vmatmul.mubr.f32.gmra.mxu1 %v3865_v24  ;;  %v3918_v41 = vpop.permute.xlu1 %1216  ;;  %v1117_v52 = vmul.f32 %v3782_v46, %v1101_v47 }
 0x31f   : > { %2631 = vpow2.f32 %v1092_v35 }
 0x320   : > { %v3877_v43 = vpop.eup %2619  ;;  %2633 = vpow2.f32 %v964_v36  ;;  %v3936_v31 = vpop.permute.xlu0 %1256 }
 0x321   : > { %v3879_v5 = vpop.eup %2621  ;;  %1144 = vadd.xlane.f32.xlu0 %v3877_v43  ;;  %2386 = vmatprep.mubr.f32.mxu1 %v3877_v43  ;;  %2635 = vpow2.f32 %v966_v6  ;;  %v1100_v6 = vld [vmem:[#allocation3 + $0x20] sm:$0xff] }
 0x322   : > { %1150 = vadd.xlane.f32.xlu1 %v3879_v5  ;;  %2387 = vmatmul.mubr.f32.gmra.mxu1 %v3871_v44  ;;  %v3922_v17 = vpop.permute.xlu1 %1221  ;;  %v1116_v39 = vmul.f32 %v3808_v57, %v1100_v6 }
 0x324   : > { %v3885_v48 = vpop.eup %2623  ;;  %v3940_v55 = vpop.permute.xlu0 %1266 }
 0x325   : > { %v3887_v62 = vpop.eup %2625  ;;  %1148 = vadd.xlane.f32.xlu0 %v3885_v48  ;;  %2389 = vmatprep.mubr.f32.mxu1 %v3885_v48 }
 0x326   : > { %1154 = vadd.xlane.f32.xlu1 %v3887_v62  ;;  %2390 = vmatmul.mubr.f32.gmra.mxu1 %v3879_v5  ;;  %v3926_v49 = vpop.permute.xlu1 %1231 }
 0x328   : > { %v3893_v54 = vpop.eup %2627  ;;  %v3945_v3 = vpop.permute.xlu0 %1276 }
 0x329   : > { %v3895_v63 = vpop.eup %2629  ;;  %1152 = vadd.xlane.f32.xlu0 %v3893_v54  ;;  %2392 = vmatprep.mubr.f32.mxu1 %v3893_v54 }
 0x32a   : > { %1158 = vadd.xlane.f32.xlu1 %v3895_v63  ;;  %2393 = vmatmul.mubr.f32.gmra.mxu1 %v3887_v62  ;;  %v3930_v25 = vpop.permute.xlu1 %1241 }
 0x32c   : > { %v3904_v11 = vpop.eup %2631 }
 0x32d   : > { %1156 = vadd.xlane.f32.xlu0 %v3904_v11  ;;  %2395 = vmatprep.mubr.f32.mxu1 %v3904_v11  ;;  %v3912_v18 = vpop.eup %2633 }
 0x32e   : > { %2396 = vmatmul.mubr.f32.gmra.mxu1 %v3895_v63  ;;  %v3915_v26 = vpop.eup %2635  ;;  %v3934_v19 = vpop.permute.xlu1 %1251 }
 0x332   : > { %v3938_v40 = vpop.permute.xlu1 %1261 }
 0x336   : > { %v3942_v21 = vpop.permute.xlu1 %1271 }
 0x33b   : > { %1281 = vperm.xlu1 %2572, %v3912_v18  }
 0x343   : > { %1286 = vperm.xlu0 %2571, %v3915_v26  }
 0x38a   : > { %v1129_v4 = vpop.xlane.xlu1 %1128 }
 0x38b   : > { %v1160_v37 = vadd.f32 %v1129_v4, %v1112_v22  ;;  %v1103_v4 = vld [vmem:[#allocation3 + $0x38] sm:$0xff] }
 0x38c   : > { %v1119_v56 = vmul.f32 %v3789_v51, %v1103_v4 }
 0x38d   : > { %1177 = vst.msk [vmem:[#allocation3] sm:$0xff] %vm1176_vm5, %v1160_v37 }
 0x38e   : > { %v1131_v16 = vpop.xlane.xlu0 %1130 }
 0x38f   : > { %v1161_v20 = vadd.f32 %v1131_v16, %v1113_v10  ;;  %v1102_v10 = vld [vmem:[#allocation3 + $0x30] sm:$0xff] }
 0x390   : > { %v1118_v46 = vmul.f32 %v3814_v58, %v1102_v10 }
 0x391   : > { %1178 = vst.msk [vmem:[#allocation3 + $0x8] sm:$0xff] %vm1176_vm5, %v1161_v20  ;;  %v1121_v20 = vmul.f32 %v3797_v53, %v1105_v30 }
 0x392   : > { %v1135_v23 = vpop.xlane.xlu1 %1134 }
 0x393   : > { %v1163_v1 = vadd.f32 %v1135_v23, %v1115_v50  ;;  %v1104_v23 = vld [vmem:[#allocation3 + $0x40] sm:$0xff] }
 0x394   : > { %v1120_v51 = vmul.f32 %v3817_v60, %v1104_v23  ;;  %v1108_v60 = vld [vmem:[#allocation3 + $0x60] sm:$0xff]  ;;  %v1193_v23 = vld [vmem:[#allocation4 + $0x30] sm:$0xff] }
 0x395   : > { %1180 = vst.msk [vmem:[#allocation3 + $0x18] sm:$0xff] %vm1176_vm5, %v1163_v1  ;;  %v1107_v1 = vld [vmem:[#allocation3 + $0x58] sm:$0xff] }
 0x396   : > { %v1133_v7 = vpop.xlane.xlu0 %1132 }
 0x397   : > { %v1162_v35 = vadd.f32 %v1133_v7, %v1114_v34  ;;  %v1123_v7 = vmul.f32 %v3805_v42, %v1107_v1 }
 0x399   : > { %1179 = vst.msk [vmem:[#allocation3 + $0x10] sm:$0xff] %vm1176_vm5, %v1162_v35  ;;  %v1106_v35 = vld [vmem:[#allocation3 + $0x50] sm:$0xff] }
 0x39a   : > { %v1139_v36 = vpop.xlane.xlu1 %1138  ;;  %v1122_v6 = vmul.f32 %v3820_v61, %v1106_v35  ;;  %v1110_v61 = vld [vmem:[#allocation3 + $0x70] sm:$0xff] }
 0x39b   : > { %v1165_v29 = vadd.f32 %v1139_v36, %v1117_v52  ;;  %v1109_v36 = vld [vmem:[#allocation3 + $0x68] sm:$0xff] }
 0x39d   : > { %1182 = vst.msk [vmem:[#allocation3 + $0x28] sm:$0xff] %vm1176_vm5, %v1165_v29  ;;  %v1125_v29 = vmul.f32 %v3811_v59, %v1109_v36  ;;  %v1126_v59 = vmul.f32 %v3912_v18, %v1110_v61  ;;  %v1195_v18 = vld [vmem:[#allocation4 + $0x58] sm:$0xff]  ;;  %v1202_v61 = vld [vmem:[#allocation4 + $0x20] sm:$0xff] }
 0x39e   : > { %v1137_v22 = vpop.xlane.xlu0 %1136 }
 0x39f   : > { %v1164_v8 = vadd.f32 %v1137_v22, %v1116_v39 }
 0x3a1   : > { %1181 = vst.msk [vmem:[#allocation3 + $0x20] sm:$0xff] %vm1176_vm5, %v1164_v8  ;;  %v1111_v8 = vld [vmem:[#allocation3 + $0x78] sm:$0xff] }
 0x3a2   : > { %v1143_v37 = vpop.xlane.xlu1 %1142 }
 0x3a3   : > { %v1167_v16 = vadd.f32 %v1143_v37, %v1119_v56  ;;  %v1124_v56 = vmul.f32 %v3823_v0, %v1108_v60  ;;  %v1127_v37 = vmul.f32 %v3915_v26, %v1111_v8  ;;  %v1194_v0 = vld [vmem:[#allocation4] sm:$0xff] }
 0x3a5   : > { %1184 = vst.msk [vmem:[#allocation3 + $0x38] sm:$0xff] %vm1176_vm5, %v1167_v16 }
 0x3a6   : > { %v1141_v50 = vpop.xlane.xlu0 %1140 }
 0x3a7   : > { %v1147_v57 = vpop.xlane.xlu1 %1146  ;;  %v1166_v38 = vadd.f32 %v1141_v50, %v1118_v46 }
 0x3a8   : > { %v1169_v34 = vadd.f32 %v1147_v57, %v1121_v20  ;;  %v1290_v57 = vmul.f32 %v3918_v41, %v1194_v0 }
 0x3a9   : > { %1183 = vst.msk [vmem:[#allocation3 + $0x30] sm:$0xff] %vm1176_vm5, %v1166_v38  ;;  %v1289_v38 = vmul.f32 %v3920_v9, %v1193_v23  ;;  %v1204_v23 = vld [vmem:[#allocation4 + $0x38] sm:$0xff] }
 0x3aa   : > { %1186 = vst.msk [vmem:[#allocation3 + $0x48] sm:$0xff] %vm1176_vm5, %v1169_v34  ;;  %v1145_v47 = vpop.xlane.xlu0 %1144 }
 0x3ab   : > { %v1151_v52 = vpop.xlane.xlu1 %1150  ;;  %v1168_v58 = vadd.f32 %v1145_v47, %v1120_v51 }
 0x3ac   : > { %v1171_v53 = vadd.f32 %v1151_v52, %v1123_v7  ;;  %v1196_v7 = vld [vmem:[#allocation4 + $0x18] sm:$0xff]  ;;  %v1291_v52 = vmul.f32 %v3922_v17, %v1195_v18  ;;  %v1206_v18 = vld [vmem:[#allocation4 + $0x70] sm:$0xff] }
 0x3ad   : > { %1185 = vst.msk [vmem:[#allocation3 + $0x40] sm:$0xff] %vm1176_vm5, %v1168_v58  ;;  %v1292_v47 = vmul.f32 %v3924_v12, %v1196_v7 }
 0x3ae   : > { %1188 = vst.msk [vmem:[#allocation3 + $0x58] sm:$0xff] %vm1176_vm5, %v1171_v53  ;;  %v1149_v39 = vpop.xlane.xlu0 %1148 }
 0x3af   : > { %v1155_v22 = vpop.xlane.xlu1 %1154  ;;  %v1170_v4 = vadd.f32 %v1149_v39, %v1122_v6  ;;  %v1198_v6 = vld [vmem:[#allocation4 + $0x68] sm:$0xff] }
 0x3b0   : > { %v1173_v42 = vadd.f32 %v1155_v22, %v1125_v29  ;;  %v1197_v29 = vld [vmem:[#allocation4 + $0x50] sm:$0xff]  ;;  %v1294_v39 = vmul.f32 %v3928_v14, %v1198_v6 }
 0x3b1   : > { %1187 = vst.msk [vmem:[#allocation3 + $0x50] sm:$0xff] %vm1176_vm5, %v1170_v4  ;;  %v1293_v22 = vmul.f32 %v3926_v49, %v1197_v29  ;;  %v1208_v29 = vld [vmem:[#allocation4 + $0x28] sm:$0xff] }
 0x3b2   : > { %1190 = vst.msk [vmem:[#allocation3 + $0x68] sm:$0xff] %vm1176_vm5, %v1173_v42  ;;  %v1153_v10 = vpop.xlane.xlu0 %1152 }
 0x3b3   : > { %v1159_v16 = vpop.xlane.xlu1 %1158  ;;  %v1172_v30 = vadd.f32 %v1153_v10, %v1124_v56  ;;  %v1200_v56 = vld [vmem:[#allocation4 + $0x48] sm:$0xff] }
 0x3b4   : > { %v1175_v46 = vadd.f32 %v1159_v16, %v1127_v37  ;;  %v1199_v37 = vld [vmem:[#allocation4 + $0x8] sm:$0xff]  ;;  %v1296_v10 = vmul.f32 %v3932_v28, %v1200_v56 }
 0x3b5   : > { %1189 = vst.msk [vmem:[#allocation3 + $0x60] sm:$0xff] %vm1176_vm5, %v1172_v30  ;;  %v1295_v30 = vmul.f32 %v3930_v25, %v1199_v37 }
 0x3b6   : > { %1192 = vst.msk [vmem:[#allocation3 + $0x78] sm:$0xff] %vm1176_vm5, %v1175_v46  ;;  %v1157_v20 = vpop.xlane.xlu0 %1156 }
 0x3b7   : > { %v1174_v50 = vadd.f32 %v1157_v20, %v1126_v59  ;;  %v1201_v59 = vld [vmem:[#allocation4 + $0x40] sm:$0xff] }
 0x3b9   : > { %1191 = vst.msk [vmem:[#allocation3 + $0x70] sm:$0xff] %vm1176_vm5, %v1174_v50  ;;  %v1298_v50 = vmul.f32 %v3936_v31, %v1202_v61 }
 0x3c5   : > { %v2376_v26 = vpop.f32.mrf.mxu1 }
 0x3c6   : > { %v1451_v1 = vadd.f32 %v2376_v26, %v1290_v57  ;;  %v1297_v26 = vmul.f32 %v3934_v19, %v1201_v59 }
 0x3c7   : > { %v1371_v34 = vpop.f32.mrf.mxu1 }
 0x3c8   : > { %1467 = vst [vmem:[#allocation4] sm:$0xff] %v1451_v1  ;;  %v1450_v51 = vadd.f32 %v1371_v34, %v1289_v38  ;;  %v1203_v1 = vld [vmem:[#allocation4 + $0x10] sm:$0xff] }
 0x3ca   : > { %1466 = vst [vmem:[#allocation4 + $0x30] sm:$0xff] %v1450_v51  ;;  %v1300_v51 = vmul.f32 %v3940_v55, %v1204_v23 }
 0x3ce   : > { %v2379_v35 = vpop.f32.mrf.mxu1 }
 0x3cf   : > { %v1453_v58 = vadd.f32 %v2379_v35, %v1292_v47  ;;  %v1299_v35 = vmul.f32 %v3938_v40, %v1203_v1 }
 0x3d0   : > { %v1381_v36 = vpop.f32.mrf.mxu1 }
 0x3d1   : > { %1469 = vst [vmem:[#allocation4 + $0x18] sm:$0xff] %v1453_v58  ;;  %v1452_v53 = vadd.f32 %v1381_v36, %v1291_v52  ;;  %v1205_v58 = vld [vmem:[#allocation4 + $0x60] sm:$0xff] }
 0x3d3   : > { %1468 = vst [vmem:[#allocation4 + $0x58] sm:$0xff] %v1452_v53  ;;  %v1302_v53 = vmul.f32 %v3945_v3, %v1206_v18 }
 0x3d6   : > { %v2382_v60 = vpop.f32.mrf.mxu1 }
 0x3d7   : > { %v1455_v4 = vadd.f32 %v2382_v60, %v1294_v39  ;;  %v3991_v39 = vpop.permute.xlu0 %1286 }
 0x3d8   : > { %v1391_v8 = vpop.f32.mrf.mxu1  ;;  %v1304_v37 = vmul.f32 %v3991_v39, %v1208_v29 }
 0x3d9   : > { %1471 = vst [vmem:[#allocation4 + $0x68] sm:$0xff] %v1455_v4  ;;  %v1454_v42 = vadd.f32 %v1391_v8, %v1293_v22  ;;  %v1301_v22 = vmul.f32 %v3942_v21, %v1205_v58  ;;  %v1207_v8 = vld [vmem:[#allocation4 + $0x78] sm:$0xff] }
 0x3db   : > { %1470 = vst [vmem:[#allocation4 + $0x50] sm:$0xff] %v1454_v42  ;;  %v3994_v42 = vpop.permute.xlu1 %1281 }
 0x3de   : > { %v2385_v16 = vpop.f32.mrf.mxu1 }
 0x3df   : > { %v1457_v46 = vadd.f32 %v2385_v16, %v1296_v10  ;;  %v1303_v16 = vmul.f32 %v3994_v42, %v1207_v8 }
 0x3e0   : > { %v1401_v20 = vpop.f32.mrf.mxu1 }
 0x3e1   : > { %1473 = vst [vmem:[#allocation4 + $0x48] sm:$0xff] %v1457_v46  ;;  %v1456_v0 = vadd.f32 %v1401_v20, %v1295_v30 }
 0x3e2   : > { %v2388_v57 = vpop.f32.mrf.mxu1 }
 0x3e3   : > { %1472 = vst [vmem:[#allocation4 + $0x8] sm:$0xff] %v1456_v0  ;;  %v1459_v38 = vadd.f32 %v2388_v57, %v1298_v50 }
 0x3e4   : > { %v1411_v34 = vpop.f32.mrf.mxu1 }
 0x3e5   : > { %1475 = vst [vmem:[#allocation4 + $0x20] sm:$0xff] %v1459_v38  ;;  %v1458_v7 = vadd.f32 %v1411_v34, %v1297_v26 }
 0x3e6   : > { %v2391_v47 = vpop.f32.mrf.mxu1 }
 0x3e7   : > { %1474 = vst [vmem:[#allocation4 + $0x40] sm:$0xff] %v1458_v7  ;;  %v1461_v52 = vadd.f32 %v2391_v47, %v1300_v51 }
 0x3e8   : > { %v1421_v36 = vpop.f32.mrf.mxu1 }
 0x3e9   : > { %1477 = vst [vmem:[#allocation4 + $0x38] sm:$0xff] %v1461_v52  ;;  %v1460_v6 = vadd.f32 %v1421_v36, %v1299_v35 }
 0x3ea   : > { %v2394_v60 = vpop.f32.mrf.mxu1 }
 0x3eb   : > { %1476 = vst [vmem:[#allocation4 + $0x10] sm:$0xff] %v1460_v6  ;;  %v1463_v4 = vadd.f32 %v2394_v60, %v1302_v53 }
 0x3ec   : > { %v1431_v56 = vpop.f32.mrf.mxu1 }
 0x3ed   : > { %1479 = vst [vmem:[#allocation4 + $0x70] sm:$0xff] %v1463_v4  ;;  %v1462_v10 = vadd.f32 %v1431_v56, %v1301_v22 }
 0x3ee   : > { %v2397_v61 = vpop.f32.mrf.mxu1 }
 0x3ef   : > { %1478 = vst [vmem:[#allocation4 + $0x60] sm:$0xff] %v1462_v10  ;;  %v1465_v30 = vadd.f32 %v2397_v61, %v1304_v37  ;;  %1501 = sbr.rel (%p2205_p10) target bundleno = 1031 (0x407), region = 60 }
 0x3f0   : > { %v1441_v46 = vpop.f32.mrf.mxu1 }
 0x3f1   : > { %1481 = vst [vmem:[#allocation4 + $0x28] sm:$0xff] %v1465_v30  ;;  %v1464_v59 = vadd.f32 %v1441_v46, %v1303_v16 }
 0x3f3   : > { %1480 = vst [vmem:[#allocation4 + $0x78] sm:$0xff] %v1464_v59 }
 0x3f4   : > { %v1502_v20 = vld [vmem:[%s3374_s30] sm:$0xff]  ;;  %v1503_v50 = vld [vmem:[%s3374_s30 + $0x8] sm:$0xff]  ;;  %v1504_v0 = vld [vmem:[%s3374_s30 + $0x10] sm:$0xff] }
 0x3f5   : > { %v1534_v23 = vmul.f32 %v1502_v20, %v3920_v9  ;;  %v1535_v57 = vmul.f32 %v1503_v50, %v3920_v9  ;;  %v1536_v26 = vmul.f32 %v1504_v0, %v3918_v41  ;;  %v1505_v38 = vld [vmem:[%s3374_s30 + $0x18] sm:$0xff]  ;;  %v1506_v1 = vld [vmem:[%s3374_s30 + $0x20] sm:$0xff]  ;;  %v1507_v34 = vld [vmem:[%s3374_s30 + $0x28] sm:$0xff] }
 0x3f6   : > { %v1537_v51 = vmul.f32 %v1505_v38, %v3918_v41  ;;  %v1538_v7 = vmul.f32 %v1506_v1, %v3922_v17  ;;  %v1539_v18 = vmul.f32 %v1507_v34, %v3922_v17  ;;  %v1508_v47 = vld [vmem:[%s3374_s30 + $0x30] sm:$0xff]  ;;  %v1509_v35 = vld [vmem:[%s3374_s30 + $0x38] sm:$0xff]  ;;  %v1510_v9 = vld [vmem:[%s3374_s30 + $0x40] sm:$0xff] }
 0x3f7   : > { %1566 = vst [vmem:[%s3374_s30] sm:$0xff] %v1534_v23  ;;  %1567 = vst [vmem:[%s3374_s30 + $0x8] sm:$0xff] %v1535_v57  ;;  %v1540_v52 = vmul.f32 %v1508_v47, %v3924_v12  ;;  %v1541_v41 = vmul.f32 %v1509_v35, %v3924_v12  ;;  %v1542_v58 = vmul.f32 %v1510_v9, %v3926_v49  ;;  %v1511_v36 = vld [vmem:[%s3374_s30 + $0x48] sm:$0xff]  ;;  %v1512_v17 = vld [vmem:[%s3374_s30 + $0x50] sm:$0xff] }
 0x3f8   : > { %1568 = vst [vmem:[%s3374_s30 + $0x10] sm:$0xff] %v1536_v26  ;;  %v1513_v53 = vld [vmem:[%s3374_s30 + $0x58] sm:$0xff]  ;;  %1569 = vst [vmem:[%s3374_s30 + $0x18] sm:$0xff] %v1537_v51  ;;  %v1543_v6 = vmul.f32 %v1511_v36, %v3926_v49  ;;  %v1544_v29 = vmul.f32 %v1512_v17, %v3928_v14  ;;  %v1514_v60 = vld [vmem:[%s3374_s30 + $0x60] sm:$0xff] }
 0x3f9   : > { %1570 = vst [vmem:[%s3374_s30 + $0x20] sm:$0xff] %v1538_v7  ;;  %1571 = vst [vmem:[%s3374_s30 + $0x28] sm:$0xff] %v1539_v18  ;;  %v1545_v12 = vmul.f32 %v1513_v53, %v3928_v14  ;;  %v1515_v22 = vld [vmem:[%s3374_s30 + $0x68] sm:$0xff]  ;;  %v1516_v4 = vld [vmem:[%s3374_s30 + $0x70] sm:$0xff]  ;;  %v1546_v8 = vmul.f32 %v1514_v60, %v3930_v25 }
 0x3fa   : > { %1572 = vst [vmem:[%s3374_s30 + $0x30] sm:$0xff] %v1540_v52  ;;  %1573 = vst [vmem:[%s3374_s30 + $0x38] sm:$0xff] %v1541_v41  ;;  %v1547_v49 = vmul.f32 %v1515_v22, %v3930_v25  ;;  %v1548_v56 = vmul.f32 %v1516_v4, %v3932_v28  ;;  %v1517_v37 = vld [vmem:[%s3374_s30 + $0x78] sm:$0xff]  ;;  %v1518_v14 = vld [vmem:[%s3374_s30 + $0x80] sm:$0xff] }
 0x3fb   : > { %1574 = vst [vmem:[%s3374_s30 + $0x40] sm:$0xff] %v1542_v58  ;;  %v1519_v10 = vld [vmem:[%s3374_s30 + $0x88] sm:$0xff]  ;;  %1575 = vst [vmem:[%s3374_s30 + $0x48] sm:$0xff] %v1543_v6  ;;  %v1549_v61 = vmul.f32 %v1517_v37, %v3932_v28  ;;  %v1550_v16 = vmul.f32 %v1518_v14, %v3934_v19  ;;  %v1520_v30 = vld [vmem:[%s3374_s30 + $0x90] sm:$0xff] }
 0x3fc   : > { %1576 = vst [vmem:[%s3374_s30 + $0x50] sm:$0xff] %v1544_v29  ;;  %1577 = vst [vmem:[%s3374_s30 + $0x58] sm:$0xff] %v1545_v12  ;;  %v1551_v25 = vmul.f32 %v1519_v10, %v3934_v19  ;;  %v1521_v46 = vld [vmem:[%s3374_s30 + $0x98] sm:$0xff]  ;;  %v1522_v59 = vld [vmem:[%s3374_s30 + $0xa0] sm:$0xff]  ;;  %v1552_v20 = vmul.f32 %v1520_v30, %v3936_v31 }
 0x3fd   : > { %1578 = vst [vmem:[%s3374_s30 + $0x60] sm:$0xff] %v1546_v8  ;;  %1579 = vst [vmem:[%s3374_s30 + $0x68] sm:$0xff] %v1547_v49  ;;  %v1553_v28 = vmul.f32 %v1521_v46, %v3936_v31  ;;  %v1554_v50 = vmul.f32 %v1522_v59, %v3938_v40  ;;  %v1523_v0 = vld [vmem:[%s3374_s30 + $0xa8] sm:$0xff]  ;;  %v1524_v19 = vld [vmem:[%s3374_s30 + $0xb0] sm:$0xff] }
 0x3fe   : > { %1580 = vst [vmem:[%s3374_s30 + $0x70] sm:$0xff] %v1548_v56  ;;  %v1525_v23 = vld [vmem:[%s3374_s30 + $0xb8] sm:$0xff]  ;;  %1581 = vst [vmem:[%s3374_s30 + $0x78] sm:$0xff] %v1549_v61  ;;  %v1555_v57 = vmul.f32 %v1523_v0, %v3938_v40  ;;  %v1556_v26 = vmul.f32 %v1524_v19, %v3940_v55  ;;  %v1526_v38 = vld [vmem:[%s3374_s30 + $0xc0] sm:$0xff] }
 0x3ff   : > { %1582 = vst [vmem:[%s3374_s30 + $0x80] sm:$0xff] %v1550_v16  ;;  %1583 = vst [vmem:[%s3374_s30 + $0x88] sm:$0xff] %v1551_v25  ;;  %v1557_v31 = vmul.f32 %v1525_v23, %v3940_v55  ;;  %v1527_v1 = vld [vmem:[%s3374_s30 + $0xc8] sm:$0xff]  ;;  %v1528_v34 = vld [vmem:[%s3374_s30 + $0xd0] sm:$0xff]  ;;  %v1558_v51 = vmul.f32 %v1526_v38, %v3942_v21 }
 0x400   : > { %1584 = vst [vmem:[%s3374_s30 + $0x90] sm:$0xff] %v1552_v20  ;;  %1585 = vst [vmem:[%s3374_s30 + $0x98] sm:$0xff] %v1553_v28  ;;  %v1559_v40 = vmul.f32 %v1527_v1, %v3942_v21  ;;  %v1560_v7 = vmul.f32 %v1528_v34, %v3945_v3  ;;  %v1529_v18 = vld [vmem:[%s3374_s30 + $0xd8] sm:$0xff]  ;;  %v1530_v55 = vld [vmem:[%s3374_s30 + $0xe0] sm:$0xff] }
 0x401   : > { %1586 = vst [vmem:[%s3374_s30 + $0xa0] sm:$0xff] %v1554_v50  ;;  %v1531_v47 = vld [vmem:[%s3374_s30 + $0xe8] sm:$0xff]  ;;  %1587 = vst [vmem:[%s3374_s30 + $0xa8] sm:$0xff] %v1555_v57  ;;  %v1561_v35 = vmul.f32 %v1529_v18, %v3945_v3  ;;  %v1562_v9 = vmul.f32 %v1530_v55, %v3994_v42  ;;  %v1532_v21 = vld [vmem:[%s3374_s30 + $0xf0] sm:$0xff] }
 0x402   : > { %1588 = vst [vmem:[%s3374_s30 + $0xb0] sm:$0xff] %v1556_v26  ;;  %1589 = vst [vmem:[%s3374_s30 + $0xb8] sm:$0xff] %v1557_v31  ;;  %v1563_v52 = vmul.f32 %v1531_v47, %v3994_v42  ;;  %v1533_v41 = vld [vmem:[%s3374_s30 + $0xf8] sm:$0xff]  ;;  %v1564_v58 = vmul.f32 %v1532_v21, %v3991_v39 }
 0x403   : > { %1590 = vst [vmem:[%s3374_s30 + $0xc0] sm:$0xff] %v1558_v51  ;;  %1591 = vst [vmem:[%s3374_s30 + $0xc8] sm:$0xff] %v1559_v40  ;;  %v1565_v36 = vmul.f32 %v1533_v41, %v3991_v39 }
 0x404   : > { %1592 = vst [vmem:[%s3374_s30 + $0xd0] sm:$0xff] %v1560_v7  ;;  %1593 = vst [vmem:[%s3374_s30 + $0xd8] sm:$0xff] %v1561_v35 }
 0x405   : > { %1594 = vst [vmem:[%s3374_s30 + $0xe0] sm:$0xff] %v1562_v9  ;;  %1595 = vst [vmem:[%s3374_s30 + $0xe8] sm:$0xff] %v1563_v52 }
 0x406   : > { %1596 = vst [vmem:[%s3374_s30 + $0xf0] sm:$0xff] %v1564_v58  ;;  %1597 = vst [vmem:[%s3374_s30 + $0xf8] sm:$0xff] %v1565_v36 }
 0x407 PF: > { %s4431_s11 = sld [smem:[#allocation26_spill]] }
 0x40d   : > { %s2206_s19 = sshll.u32 %s4431_s11, 7  ;;  %p2208_p11 = scmp.ne.s32.totalorder %s4431_s11, 1 }
 0x40e   : > { %s1599_s25 = sshra.s32 %s2206_s19, 7 }
 0x40f   : > { %s2207_s5 = sshll.u32 %s1599_s25, 3 }
 0x410   : > { %s1602_s3 = scalar_lea.vmem %s3374_s30, %s2207_s5 [#allocation14] }
 0x411   : > { %1603 = vst [vmem:[%s1602_s3] sm:$0xff] %v3831_v33  ;;  %1604 = vst [vmem:[%s1602_s3 + $0x10] sm:$0xff] %v3836_v13 }
 0x412   : > { %1605 = vst [vmem:[%s1602_s3 + $0x20] sm:$0xff] %v3846_v27  ;;  %1606 = vst [vmem:[%s1602_s3 + $0x30] sm:$0xff] %v3841_v45 }
 0x413   : > { %1607 = vst [vmem:[%s1602_s3 + $0x40] sm:$0xff] %v3858_v15  ;;  %1608 = vst [vmem:[%s1602_s3 + $0x50] sm:$0xff] %v3853_v2 }
 0x414   : > { %1609 = vst [vmem:[%s1602_s3 + $0x60] sm:$0xff] %v3869_v32  ;;  %1610 = vst [vmem:[%s1602_s3 + $0x70] sm:$0xff] %v3865_v24  ;;  %1622 = sbr.rel (%p2208_p11) target bundleno = 1227 (0x4cb), region = 64 }
 0x415   : > { %1611 = vst [vmem:[%s1602_s3 + $0x80] sm:$0xff] %v3877_v43  ;;  %1612 = vst [vmem:[%s1602_s3 + $0x90] sm:$0xff] %v3871_v44 }
 0x416   : > { %1613 = vst [vmem:[%s1602_s3 + $0xa0] sm:$0xff] %v3885_v48  ;;  %1614 = vst [vmem:[%s1602_s3 + $0xb0] sm:$0xff] %v3879_v5 }
 0x417   : > { %1615 = vst [vmem:[%s1602_s3 + $0xc0] sm:$0xff] %v3893_v54  ;;  %1616 = vst [vmem:[%s1602_s3 + $0xd0] sm:$0xff] %v3887_v62 }
 0x418   : > { %1617 = vst [vmem:[%s1602_s3 + $0xe0] sm:$0xff] %v3904_v11  ;;  %1618 = vst [vmem:[%s1602_s3 + $0xf0] sm:$0xff] %v3895_v63 }
 0x419   : > { %v1625_v33 = vld [vmem:[#allocation3 + $0x10] sm:$0xff]  ;;  %v1623_v13 = vld [vmem:[#allocation3] sm:$0xff]  ;;  %v1626_v45 = vld [vmem:[#allocation3 + $0x18] sm:$0xff]  ;;  %v2993_v27 = vmov 0  }
 0x41a   : > { %2638 = vset.pattern.permute.xlu1 %v2993_v27  ;;  %2637 = vset.pattern.permute.xlu0 %v2993_v27  ;;  %2639 = vrcp.f32 %v1625_v33  ;;  %v1624_v2 = vld [vmem:[#allocation3 + $0x8] sm:$0xff]  ;;  %v1627_v24 = vld [vmem:[#allocation3 + $0x20] sm:$0xff]  ;;  %v1630_v32 = vld [vmem:[#allocation3 + $0x38] sm:$0xff] }
 0x41b   : > { %2641 = vrcp.f32 %v1623_v13  ;;  %v1628_v15 = vld [vmem:[#allocation3 + $0x28] sm:$0xff]  ;;  %v1629_v44 = vld [vmem:[#allocation3 + $0x30] sm:$0xff]  ;;  %v1631_v5 = vld [vmem:[#allocation3 + $0x40] sm:$0xff] }
 0x41c   : > { %2643 = vrcp.f32 %v1626_v45  ;;  %v1632_v43 = vld [vmem:[#allocation3 + $0x48] sm:$0xff]  ;;  %v1634_v48 = vld [vmem:[#allocation3 + $0x58] sm:$0xff]  ;;  %v1633_v62 = vld [vmem:[#allocation3 + $0x50] sm:$0xff] }
 0x41d   : > { %2645 = vrcp.f32 %v1624_v2  ;;  %v1636_v63 = vld [vmem:[#allocation3 + $0x68] sm:$0xff]  ;;  %v1635_v39 = vld [vmem:[#allocation3 + $0x60] sm:$0xff]  ;;  %v1638_v4 = vld [vmem:[#allocation3 + $0x78] sm:$0xff] }
 0x41e   : > { %2647 = vrcp.f32 %v1628_v15  ;;  %v1637_v14 = vld [vmem:[#allocation3 + $0x70] sm:$0xff] }
 0x41f   : > { %2649 = vrcp.f32 %v1627_v24 }
 0x420   : > { %2651 = vrcp.f32 %v1630_v32 }
 0x421   : > { %2653 = vrcp.f32 %v1629_v44 }
 0x422   : > { %2655 = vrcp.f32 %v1632_v43 }
 0x423   : > { %2657 = vrcp.f32 %v1631_v5 }
 0x424   : > { %2659 = vrcp.f32 %v1634_v48 }
 0x425   : > { %2661 = vrcp.f32 %v1633_v62 }
 0x426   : > { %2663 = vrcp.f32 %v1636_v63 }
 0x427   : > { %v2640_v54 = vpop.eup %2639  ;;  %2665 = vrcp.f32 %v1635_v39 }
 0x428   : > { %v2642_v11 = vpop.eup %2641  ;;  %v1657_v3 = vmul.f32 %v2640_v54, %v1625_v33  ;;  %2667 = vrcp.f32 %v1638_v4 }
 0x429   : > { %v2644_v42 = vpop.eup %2643  ;;  %v1655_v17 = vmul.f32 %v2642_v11, %v1623_v13  ;;  %2669 = vrcp.f32 %v1637_v14 }
 0x42a   : > { %v2646_v53 = vpop.eup %2645  ;;  %v1673_v6 = vsub.f32 2.0, %v1657_v3  ;;  %v1658_v29 = vmul.f32 %v2644_v42, %v1626_v45 }
 0x42b   : > { %v2648_v12 = vpop.eup %2647  ;;  %v1671_v60 = vsub.f32 2.0, %v1655_v17  ;;  %v1656_v22 = vmul.f32 %v2646_v53, %v1624_v2  ;;  %v1836_v17 = vld [vmem:[%s3374_s30 + $0x28] sm:$0xff] }
 0x42c   : > { %v2650_v8 = vpop.eup %2649  ;;  %v1689_v49 = vmul.f32 %v2640_v54, %v1673_v6  ;;  %v1674_v56 = vsub.f32 2.0, %v1658_v29  ;;  %v1660_v37 = vmul.f32 %v2648_v12, %v1628_v15  ;;  %v1831_v6 = vld [vmem:[%s3374_s30] sm:$0xff]  ;;  %v1832_v29 = vld [vmem:[%s3374_s30 + $0x8] sm:$0xff] }
 0x42d   : > { %v2652_v10 = vpop.eup %2651  ;;  %v1687_v61 = vmul.f32 %v2642_v11, %v1671_v60  ;;  %v1672_v16 = vsub.f32 2.0, %v1656_v22  ;;  %v1659_v25 = vmul.f32 %v2650_v8, %v1627_v24 }
 0x42e   : > { %v2654_v30 = vpop.eup %2653  ;;  %1731 = vperm.xlu1 %2638, %v1689_v49   ;;  %v1690_v46 = vmul.f32 %v2644_v42, %v1674_v56  ;;  %v1676_v59 = vsub.f32 2.0, %v1660_v37  ;;  %v1662_v20 = vmul.f32 %v2652_v10, %v1630_v32  ;;  %v1835_v42 = vld [vmem:[%s3374_s30 + $0x20] sm:$0xff] }
 0x42f   : > { %v2656_v28 = vpop.eup %2655  ;;  %1721 = vperm.xlu0 %2637, %v1687_v61   ;;  %v1688_v50 = vmul.f32 %v2646_v53, %v1672_v16  ;;  %v1675_v0 = vsub.f32 2.0, %v1659_v25  ;;  %v1661_v19 = vmul.f32 %v2654_v30, %v1629_v44  ;;  %v1703_v53 = vld [vmem:[#allocation4 + $0x30] sm:$0xff]  ;;  %v1838_v61 = vld [vmem:[%s3374_s30 + $0x38] sm:$0xff]  ;;  %v1704_v16 = vld [vmem:[#allocation4] sm:$0xff] }
 0x430   : > { %v2658_v23 = vpop.eup %2657  ;;  %v1692_v57 = vmul.f32 %v2648_v12, %v1676_v59  ;;  %v1678_v26 = vsub.f32 2.0, %v1662_v20  ;;  %v1664_v31 = vmul.f32 %v2656_v28, %v1632_v43  ;;  %v1833_v25 = vld [vmem:[%s3374_s30 + $0x10] sm:$0xff] }
 0x431   : > { %v2660_v38 = vpop.eup %2659  ;;  %v1691_v1 = vmul.f32 %v2650_v8, %v1675_v0  ;;  %v1677_v34 = vsub.f32 2.0, %v1661_v19  ;;  %v1663_v51 = vmul.f32 %v2658_v23, %v1631_v5 }
 0x432   : > { %1736 = vperm.xlu1 %2638, %v1690_v46   ;;  %v2662_v40 = vpop.eup %2661  ;;  %v1694_v7 = vmul.f32 %v2652_v10, %v1678_v26  ;;  %v1680_v18 = vsub.f32 2.0, %v1664_v31  ;;  %v1666_v55 = vmul.f32 %v2660_v38, %v1634_v48  ;;  %v1837_v10 = vld [vmem:[%s3374_s30 + $0x30] sm:$0xff]  ;;  %v1842_v31 = vld [vmem:[%s3374_s30 + $0x58] sm:$0xff] }
 0x433   : > { %1726 = vperm.xlu0 %2637, %v1688_v50   ;;  %v2664_v47 = vpop.eup %2663  ;;  %v1693_v35 = vmul.f32 %v2654_v30, %v1677_v34  ;;  %v1679_v9 = vsub.f32 2.0, %v1663_v51  ;;  %v1665_v52 = vmul.f32 %v2662_v40, %v1633_v62  ;;  %v1834_v30 = vld [vmem:[%s3374_s30 + $0x18] sm:$0xff]  ;;  %v1841_v26 = vld [vmem:[%s3374_s30 + $0x50] sm:$0xff]  ;;  %v1840_v34 = vld [vmem:[%s3374_s30 + $0x48] sm:$0xff] }
 0x434   : > { %v2666_v21 = vpop.eup %2665  ;;  %v1696_v41 = vmul.f32 %v2656_v28, %v1680_v18  ;;  %v1682_v58 = vsub.f32 2.0, %v1666_v55  ;;  %v1668_v36 = vmul.f32 %v2664_v47, %v1636_v63 }
 0x435   : > { %v2668_v33 = vpop.eup %2667  ;;  %v1695_v13 = vmul.f32 %v2658_v23, %v1679_v9  ;;  %v1681_v45 = vsub.f32 2.0, %v1665_v52  ;;  %v1667_v27 = vmul.f32 %v2666_v21, %v1635_v39  ;;  %v1705_v39 = vld [vmem:[#allocation4 + $0x58] sm:$0xff]  ;;  %v1710_v52 = vld [vmem:[#allocation4 + $0x48] sm:$0xff] }
 0x436   : > { %1746 = vperm.xlu1 %2638, %v1692_v57   ;;  %v2670_v2 = vpop.eup %2669  ;;  %v1698_v15 = vmul.f32 %v2660_v38, %v1682_v58  ;;  %v1684_v24 = vsub.f32 2.0, %v1668_v36  ;;  %v1670_v32 = vmul.f32 %v2668_v33, %v1638_v4  ;;  %v1708_v57 = vld [vmem:[#allocation4 + $0x68] sm:$0xff]  ;;  %v1707_v38 = vld [vmem:[#allocation4 + $0x50] sm:$0xff]  ;;  %v1843_v36 = vld [vmem:[%s3374_s30 + $0x60] sm:$0xff] }
 0x437   : > { %1741 = vperm.xlu0 %2637, %v1691_v1   ;;  %v1697_v44 = vmul.f32 %v2662_v40, %v1681_v45  ;;  %v1683_v43 = vsub.f32 2.0, %v1667_v27  ;;  %v1669_v5 = vmul.f32 %v2670_v2, %v1637_v14  ;;  %v1706_v14 = vld [vmem:[#allocation4 + $0x18] sm:$0xff]  ;;  %v1839_v1 = vld [vmem:[%s3374_s30 + $0x40] sm:$0xff]  ;;  %v1709_v58 = vld [vmem:[#allocation4 + $0x8] sm:$0xff] }
 0x438   : > { %v1700_v48 = vmul.f32 %v2664_v47, %v1684_v24  ;;  %v1686_v62 = vsub.f32 2.0, %v1670_v32 }
 0x439   : > { %v1699_v54 = vmul.f32 %v2666_v21, %v1683_v43  ;;  %v1685_v63 = vsub.f32 2.0, %v1669_v5  ;;  %v1845_v21 = vld [vmem:[%s3374_s30 + $0x70] sm:$0xff]  ;;  %v1712_v43 = vld [vmem:[#allocation4 + $0x20] sm:$0xff] }
 0x43a   : > { %1756 = vperm.xlu1 %2638, %v1694_v7   ;;  %v1702_v11 = vmul.f32 %v2668_v33, %v1686_v62  ;;  %v1844_v33 = vld [vmem:[%s3374_s30 + $0x68] sm:$0xff]  ;;  %v1849_v5 = vld [vmem:[%s3374_s30 + $0x90] sm:$0xff]  ;;  %v1711_v62 = vld [vmem:[#allocation4 + $0x40] sm:$0xff] }
 0x43b   : > { %1751 = vperm.xlu0 %2637, %v1693_v35   ;;  %v1701_v3 = vmul.f32 %v2670_v2, %v1685_v63  ;;  %v1848_v63 = vld [vmem:[%s3374_s30 + $0x88] sm:$0xff] }
 0x43e   : > { %1766 = vperm.xlu1 %2638, %v1696_v41   ;;  %v1846_v41 = vld [vmem:[%s3374_s30 + $0x78] sm:$0xff] }
 0x43f   : > { %1761 = vperm.xlu0 %2637, %v1695_v13  }
 0x442   : > { %1776 = vperm.xlu1 %2638, %v1698_v15  }
 0x443   : > { %1771 = vperm.xlu0 %2637, %v1697_v44  }
 0x446   : > { %1786 = vperm.xlu1 %2638, %v1700_v48   ;;  %v1850_v48 = vld [vmem:[%s3374_s30 + $0x98] sm:$0xff] }
 0x447   : > { %1781 = vperm.xlu0 %2637, %v1699_v54   ;;  %v1847_v54 = vld [vmem:[%s3374_s30 + $0x80] sm:$0xff] }
 0x44a   : > { %1796 = vperm.xlu1 %2638, %v1702_v11  }
 0x44b   : > { %1791 = vperm.xlu0 %2637, %v1701_v3  }
 0x4a9   : > { %v1732_v12 = vpop.permute.xlu1 %1731 }
 0x4aa   : > { %v1801_v60 = vmul.f32 %v1732_v12, %v1705_v39  ;;  %v1867_v22 = vmul.f32 %v1835_v42, %v1732_v12  ;;  %v1868_v4 = vmul.f32 %v1836_v17, %v1732_v12  ;;  %v1722_v8 = vpop.permute.xlu0 %1721  ;;  %v1714_v12 = vld [vmem:[#allocation4 + $0x38] sm:$0xff] }
 0x4ab   : > { %v1799_v49 = vmul.f32 %v1722_v8, %v1703_v53  ;;  %v1863_v56 = vmul.f32 %v1831_v6, %v1722_v8  ;;  %v1864_v37 = vmul.f32 %v1832_v29, %v1722_v8  ;;  %v1851_v8 = vld [vmem:[%s3374_s30 + $0xa0] sm:$0xff] }
 0x4ac   : > { %1817 = vst [vmem:[%s3372_s12 + $0x10] sm:$0xff] %v1801_v60  ;;  %1899 = vst [vmem:[%s3374_s30 + $0x20] sm:$0xff] %v1867_v22  ;;  %v1853_v60 = vld [vmem:[%s3374_s30 + $0xb0] sm:$0xff]  ;;  %v1854_v22 = vld [vmem:[%s3374_s30 + $0xb8] sm:$0xff] }
 0x4ad   : > { %1900 = vst [vmem:[%s3374_s30 + $0x28] sm:$0xff] %v1868_v4  ;;  %1815 = vst [vmem:[%s3372_s12] sm:$0xff] %v1799_v49  ;;  %v1737_v46 = vpop.permute.xlu1 %1736  ;;  %v1713_v4 = vld [vmem:[#allocation4 + $0x10] sm:$0xff]  ;;  %v1852_v49 = vld [vmem:[%s3374_s30 + $0xa8] sm:$0xff] }
 0x4ae   : > { %1895 = vst [vmem:[%s3374_s30] sm:$0xff] %v1863_v56  ;;  %1896 = vst [vmem:[%s3374_s30 + $0x8] sm:$0xff] %v1864_v37  ;;  %v1802_v59 = vmul.f32 %v1737_v46, %v1706_v14  ;;  %v1869_v20 = vmul.f32 %v1837_v10, %v1737_v46  ;;  %v1870_v28 = vmul.f32 %v1838_v61, %v1737_v46  ;;  %v1727_v50 = vpop.permute.xlu0 %1726  ;;  %v1716_v46 = vld [vmem:[#allocation4 + $0x70] sm:$0xff] }
 0x4af   : > { %v1800_v0 = vmul.f32 %v1727_v50, %v1704_v16  ;;  %v1865_v19 = vmul.f32 %v1833_v25, %v1727_v50  ;;  %v1866_v23 = vmul.f32 %v1834_v30, %v1727_v50  ;;  %v1855_v50 = vld [vmem:[%s3374_s30 + $0xc0] sm:$0xff] }
 0x4b0   : > { %1818 = vst [vmem:[%s3372_s12 + $0x18] sm:$0xff] %v1802_v59  ;;  %1901 = vst [vmem:[%s3374_s30 + $0x30] sm:$0xff] %v1869_v20  ;;  %v1857_v59 = vld [vmem:[%s3374_s30 + $0xd0] sm:$0xff]  ;;  %v1858_v20 = vld [vmem:[%s3374_s30 + $0xd8] sm:$0xff] }
 0x4b1   : > { %1902 = vst [vmem:[%s3374_s30 + $0x38] sm:$0xff] %v1870_v28  ;;  %1816 = vst [vmem:[%s3372_s12 + $0x8] sm:$0xff] %v1800_v0  ;;  %v1747_v51 = vpop.permute.xlu1 %1746  ;;  %v1715_v28 = vld [vmem:[#allocation4 + $0x60] sm:$0xff]  ;;  %v1856_v0 = vld [vmem:[%s3374_s30 + $0xc8] sm:$0xff] }
 0x4b2   : > { %1897 = vst [vmem:[%s3374_s30 + $0x10] sm:$0xff] %v1865_v19  ;;  %1898 = vst [vmem:[%s3374_s30 + $0x18] sm:$0xff] %v1866_v23  ;;  %v1804_v40 = vmul.f32 %v1747_v51, %v1708_v57  ;;  %v1873_v7 = vmul.f32 %v1841_v26, %v1747_v51  ;;  %v1874_v18 = vmul.f32 %v1842_v31, %v1747_v51  ;;  %v1742_v55 = vpop.permute.xlu0 %1741  ;;  %v1718_v51 = vld [vmem:[#allocation4 + $0x28] sm:$0xff] }
 0x4b3   : > { %v1803_v47 = vmul.f32 %v1742_v55, %v1707_v38  ;;  %v1871_v35 = vmul.f32 %v1839_v1, %v1742_v55  ;;  %v1872_v9 = vmul.f32 %v1840_v34, %v1742_v55  ;;  %v1859_v55 = vld [vmem:[%s3374_s30 + $0xe0] sm:$0xff] }
 0x4b4   : > { %1820 = vst [vmem:[%s3372_s12 + $0x28] sm:$0xff] %v1804_v40  ;;  %1905 = vst [vmem:[%s3374_s30 + $0x50] sm:$0xff] %v1873_v7  ;;  %v1861_v40 = vld [vmem:[%s3374_s30 + $0xf0] sm:$0xff]  ;;  %v1862_v7 = vld [vmem:[%s3374_s30 + $0xf8] sm:$0xff] }
 0x4b5   : > { %1906 = vst [vmem:[%s3374_s30 + $0x58] sm:$0xff] %v1874_v18  ;;  %1819 = vst [vmem:[%s3372_s12 + $0x20] sm:$0xff] %v1803_v47  ;;  %v1757_v13 = vpop.permute.xlu1 %1756  ;;  %v1717_v18 = vld [vmem:[#allocation4 + $0x78] sm:$0xff]  ;;  %v1860_v47 = vld [vmem:[%s3374_s30 + $0xe8] sm:$0xff] }
 0x4b6   : > { %1903 = vst [vmem:[%s3374_s30 + $0x40] sm:$0xff] %v1871_v35  ;;  %1904 = vst [vmem:[%s3374_s30 + $0x48] sm:$0xff] %v1872_v9  ;;  %v1806_v45 = vmul.f32 %v1757_v13, %v1710_v52  ;;  %v1877_v27 = vmul.f32 %v1845_v21, %v1757_v13  ;;  %v1878_v2 = vmul.f32 %v1846_v41, %v1757_v13  ;;  %v1752_v15 = vpop.permute.xlu0 %1751 }
 0x4b7   : > { %v1805_v24 = vmul.f32 %v1752_v15, %v1709_v58  ;;  %v1875_v32 = vmul.f32 %v1843_v36, %v1752_v15  ;;  %v1876_v44 = vmul.f32 %v1844_v33, %v1752_v15 }
 0x4b8   : > { %1822 = vst [vmem:[%s3372_s12 + $0x38] sm:$0xff] %v1806_v45  ;;  %1909 = vst [vmem:[%s3374_s30 + $0x70] sm:$0xff] %v1877_v27 }
 0x4b9   : > { %1910 = vst [vmem:[%s3374_s30 + $0x78] sm:$0xff] %v1878_v2  ;;  %1821 = vst [vmem:[%s3372_s12 + $0x30] sm:$0xff] %v1805_v24  ;;  %v1767_v11 = vpop.permute.xlu1 %1766 }
 0x4ba   : > { %1907 = vst [vmem:[%s3374_s30 + $0x60] sm:$0xff] %v1875_v32  ;;  %1908 = vst [vmem:[%s3374_s30 + $0x68] sm:$0xff] %v1876_v44  ;;  %v1808_v3 = vmul.f32 %v1767_v11, %v1712_v43  ;;  %v1881_v39 = vmul.f32 %v1849_v5, %v1767_v11  ;;  %v1882_v42 = vmul.f32 %v1850_v48, %v1767_v11  ;;  %v1762_v17 = vpop.permute.xlu0 %1761 }
 0x4bb   : > { %v1807_v53 = vmul.f32 %v1762_v17, %v1711_v62  ;;  %v1879_v6 = vmul.f32 %v1847_v54, %v1762_v17  ;;  %v1880_v29 = vmul.f32 %v1848_v63, %v1762_v17 }
 0x4bc   : > { %1824 = vst [vmem:[%s3372_s12 + $0x48] sm:$0xff] %v1808_v3  ;;  %1913 = vst [vmem:[%s3374_s30 + $0x90] sm:$0xff] %v1881_v39 }
 0x4bd   : > { %1914 = vst [vmem:[%s3374_s30 + $0x98] sm:$0xff] %v1882_v42  ;;  %1823 = vst [vmem:[%s3372_s12 + $0x40] sm:$0xff] %v1807_v53  ;;  %v1777_v56 = vpop.permute.xlu1 %1776 }
 0x4be   : > { %1911 = vst [vmem:[%s3374_s30 + $0x80] sm:$0xff] %v1879_v6  ;;  %1912 = vst [vmem:[%s3374_s30 + $0x88] sm:$0xff] %v1880_v29  ;;  %v1810_v37 = vmul.f32 %v1777_v56, %v1714_v12  ;;  %v1885_v14 = vmul.f32 %v1853_v60, %v1777_v56  ;;  %v1886_v10 = vmul.f32 %v1854_v22, %v1777_v56  ;;  %v1772_v61 = vpop.permute.xlu0 %1771 }
 0x4bf   : > { %v1809_v16 = vmul.f32 %v1772_v61, %v1713_v4  ;;  %v1883_v25 = vmul.f32 %v1851_v8, %v1772_v61  ;;  %v1884_v30 = vmul.f32 %v1852_v49, %v1772_v61 }
 0x4c0   : > { %1826 = vst [vmem:[%s3372_s12 + $0x58] sm:$0xff] %v1810_v37  ;;  %1917 = vst [vmem:[%s3374_s30 + $0xb0] sm:$0xff] %v1885_v14 }
 0x4c1   : > { %1918 = vst [vmem:[%s3374_s30 + $0xb8] sm:$0xff] %v1886_v10  ;;  %1825 = vst [vmem:[%s3372_s12 + $0x50] sm:$0xff] %v1809_v16  ;;  %v1787_v19 = vpop.permute.xlu1 %1786 }
 0x4c2   : > { %1915 = vst [vmem:[%s3374_s30 + $0xa0] sm:$0xff] %v1883_v25  ;;  %1916 = vst [vmem:[%s3374_s30 + $0xa8] sm:$0xff] %v1884_v30  ;;  %v1812_v23 = vmul.f32 %v1787_v19, %v1716_v46  ;;  %v1889_v57 = vmul.f32 %v1857_v59, %v1787_v19  ;;  %v1890_v26 = vmul.f32 %v1858_v20, %v1787_v19  ;;  %v1782_v31 = vpop.permute.xlu0 %1781 }
 0x4c3   : > { %v1811_v38 = vmul.f32 %v1782_v31, %v1715_v28  ;;  %v1887_v1 = vmul.f32 %v1855_v50, %v1782_v31  ;;  %v1888_v34 = vmul.f32 %v1856_v0, %v1782_v31 }
 0x4c4   : > { %1828 = vst [vmem:[%s3372_s12 + $0x68] sm:$0xff] %v1812_v23  ;;  %1921 = vst [vmem:[%s3374_s30 + $0xd0] sm:$0xff] %v1889_v57 }
 0x4c5   : > { %1922 = vst [vmem:[%s3374_s30 + $0xd8] sm:$0xff] %v1890_v26  ;;  %1827 = vst [vmem:[%s3372_s12 + $0x60] sm:$0xff] %v1811_v38  ;;  %v1797_v35 = vpop.permute.xlu1 %1796 }
 0x4c6   : > { %1919 = vst [vmem:[%s3374_s30 + $0xc0] sm:$0xff] %v1887_v1  ;;  %1920 = vst [vmem:[%s3374_s30 + $0xc8] sm:$0xff] %v1888_v34  ;;  %v1814_v9 = vmul.f32 %v1797_v35, %v1718_v51  ;;  %v1893_v52 = vmul.f32 %v1861_v40, %v1797_v35  ;;  %v1894_v21 = vmul.f32 %v1862_v7, %v1797_v35  ;;  %v1792_v41 = vpop.permute.xlu0 %1791 }
 0x4c7   : > { %v1813_v58 = vmul.f32 %v1792_v41, %v1717_v18  ;;  %v1891_v36 = vmul.f32 %v1859_v55, %v1792_v41  ;;  %v1892_v33 = vmul.f32 %v1860_v47, %v1792_v41 }
 0x4c8   : > { %1830 = vst [vmem:[%s3372_s12 + $0x78] sm:$0xff] %v1814_v9  ;;  %1925 = vst [vmem:[%s3374_s30 + $0xf0] sm:$0xff] %v1893_v52 }
 0x4c9   : > { %1926 = vst [vmem:[%s3374_s30 + $0xf8] sm:$0xff] %v1894_v21  ;;  %1829 = vst [vmem:[%s3372_s12 + $0x70] sm:$0xff] %v1813_v58 }
 0x4ca   : > { %1923 = vst [vmem:[%s3374_s30 + $0xe0] sm:$0xff] %v1891_v36  ;;  %1924 = vst [vmem:[%s3374_s30 + $0xe8] sm:$0xff] %v1892_v33 }
 0x4cb PF: > { %s4432_s21 = sld [smem:[#allocation27_spill]]  ;;  %s1948_s1 = sshll.u32 %s3372_s12, 4  ;;  %s4197_s1 = int_to_ptr.vmem [resolvable:$true] %s1948_s1 }
 0x4cc   : > { %s4433_s13 = sld [smem:[#allocation28_spill]]  ;;  %s1928_s14 = scalar_lea.sflag [#allocation7], %s3344_s27 }
 0x4cd   : > { %s4434_s10 = sld [smem:[#allocation35_spill]]  ;;  %s2783_s11 = scalar_lea.vmem %s4197_s1, 2048 }
 0x4ce   : > { %s4435_s9 = sld [smem:[#allocation42_spill]]  ;;  %p2784_p1 = scmp.ne.s32.totalorder %s4197_s1, %s2783_s11 }
 0x4cf   : > { %s2994_s19 = smov [#allocation13]  }
 0x4d0   : > { %s2787_s12 = sshll.u32 %s2994_s19, 4  ;;  %s2788_s12 = int_to_ptr.vmem [resolvable:$false] %s2787_s12 }
 0x4d1   : > { %s2211_s29 = sshll.u32 %s4432_s21, 4  ;;  %s2789_s25 = scalar_lea.vmem %s2788_s12, 4096 }
 0x4d2   : > { %s2212_s22 = sshll.u32 %s4433_s13, 5  ;;  %p2790_p5 = scmp.lt.s32.totalorder %s4197_s1, %s2788_s12 }
 0x4d3   : > { %s1945_s15 = sadd.s32 %s2212_s22, %s2211_s29  ;;  %p4436_p2 = scmp.ne.s32.totalorder %s4434_s10, 0 }
 0x4d4   : > { %s2213_s4 = sshll.u32 %s1945_s15, 7  ;;  %p2791_p13 = scmp.lt.s32.totalorder %s2789_s25, %s2783_s11 }
 0x4d5   : > { %s4202_s16 = scalar_lea.hbm %s4435_s9, %s2213_s4  ;;  %p2785_p0 = pnand %p2784_p1, %p4436_p2 }
 0x4d6   : > { %p2792_p8 = por %p2791_p13, %p2790_p5 }
 0x4d7   : > { %p2786_p3 = pneg %p2785_p0 }
 0x4d9   : > { %p2793_p4 = pnand %p2792_p8, %p2786_p3 }
 0x4db   : > { %2796 = shalt.err (!%p2793_p4)
}
 0x4dc   : > { %s2797_s5 = scalar_lea.hbm %s4202_s16, 2048  ;;  %s2801_s22 = scalar_lea.hbm %s4435_s9, 8192 }
 0x4dd   : > { %p2798_p6 = scmp.ne.s32.totalorder %s4202_s16, %s2797_s5  ;;  %p2802_p9 = scmp.lt.s32.totalorder %s4202_s16, %s4435_s9 }
 0x4de   : > { %p2803_p10 = scmp.lt.s32.totalorder %s2801_s22, %s2797_s5 }
 0x4df   : > { %p2799_p7 = pnand %p2798_p6, %p4436_p2 }
 0x4e0   : > { %p2804_p11 = por %p2803_p10, %p2802_p9 }
 0x4e1   : > { %p2800_p12 = pneg %p2799_p7 }
 0x4e3   : > { %p2805_p1 = pnand %p2804_p11, %p2800_p12 }
 0x4e5   : > { %2808 = shalt.err (!%p2805_p1)
}
 0x4e6   : > { %s2995_s2 = smov 128   ;;  %s2996_s24 = smov 8  }
 0x4e7   : > { %2406 = dma.vmem_to_hbm [thread:$0]  (%p4436_p2), %s4197_s1, 2048, %s4202_s16, %s1928_s14, %s2995_s2, %s2995_s2, %s2996_s24  }
 0x4e8   : > { %s2221_s11 = sshll.u32 %s4432_s21, 5  ;;  %s2216_s19 = sshll.u32 %s4433_s13, 6 }
 0x4e9   : > { %s1967_s12 = sshll.u32 %s3374_s30, 4  ;;  %s1964_s25 = sadd.s32 %s2221_s11, %s2216_s19  ;;  %s4230_s12 = int_to_ptr.vmem [resolvable:$true] %s1967_s12 }
 0x4ea   : > { %s2217_s5 = sshll.u32 %s1964_s25, 7  ;;  %s4437_s22 = sld [smem:[#allocation43_spill]] }
 0x4eb   : > { %s1933_s0 = scalar_lea.sflag [#allocation15], %s3344_s27  ;;  %s2809_s9 = scalar_lea.vmem %s4230_s12, 4096 }
 0x4ec   : > { %p2810_p0 = scmp.ne.s32.totalorder %s4230_s12, %s2809_s9  ;;  %s2997_s21 = smov [#allocation14]  }
 0x4ed   : > { %s2813_s30 = sshll.u32 %s2997_s21, 4  ;;  %s2814_s30 = int_to_ptr.vmem [resolvable:$false] %s2813_s30 }
 0x4ee   : > { %p2811_p3 = pnand %p2810_p0, %p4436_p2  ;;  %s2815_s13 = scalar_lea.vmem %s2814_s30, 8192 }
 0x4ef   : > { %p2816_p13 = scmp.lt.s32.totalorder %s4230_s12, %s2814_s30  ;;  %p2817_p8 = scmp.lt.s32.totalorder %s2815_s13, %s2809_s9 }
 0x4f0   : > { %s4438_s15 = smov %s4437_s22  ;;  %s4235_s4 = scalar_lea.hbm %s4437_s22, %s2217_s5 }
 0x4f1   : > { %p2812_p5 = pneg %p2811_p3  ;;  %p2818_p4 = por %p2817_p8, %p2816_p13 }
 0x4f3   : > { %p2819_p6 = pnand %p2818_p4, %p2812_p5 }
 0x4f5   : > { %2822 = shalt.err (!%p2819_p6)
}
 0x4f6   : > { %s2823_s1 = scalar_lea.hbm %s4235_s4, 4096  ;;  %s2827_s2 = scalar_lea.hbm %s4438_s15, 16384 }
 0x4f7   : > { %p2824_p7 = scmp.ne.s32.totalorder %s4235_s4, %s2823_s1  ;;  %p2828_p10 = scmp.lt.s32.totalorder %s4235_s4, %s4438_s15 }
 0x4f8   : > { %p2829_p11 = scmp.lt.s32.totalorder %s2827_s2, %s2823_s1 }
 0x4f9   : > { %p2825_p12 = pnand %p2824_p7, %p4436_p2 }
 0x4fa   : > { %p2830_p1 = por %p2829_p11, %p2828_p10 }
 0x4fb   : > { %p2826_p9 = pneg %p2825_p12 }
 0x4fd   : > { %p2831_p0 = pnand %p2830_p1, %p2826_p9 }
 0x4ff   : > { %2834 = shalt.err (!%p2831_p0)
}
 0x500   : > { %s2998_s9 = smov 256   ;;  %s2999_s19 = smov 16  }
 0x501   : > { %2407 = dma.vmem_to_hbm [thread:$0]  (%p4436_p2), %s4230_s12, 4096, %s4235_s4, %s1933_s0, %s2998_s9, %s2998_s9, %s2999_s19  }
 0x502 PF: > { %s4439_s25 = sld [smem:[#allocation24_spill]]  ;;  %p2431_p3 = scmp.ge.s32.totalorder %s2981_s8, 2 }
 0x503   : > { %s4440_s5 = sld [smem:[#allocation37_spill]] }
 0x508   : > { %s1982_s3 = sand.u32 1, %s4439_s25  }
 0x509   : > { %p4441_p5 = scmp.ne.s32.totalorder %s4440_s5, 0  ;;  %s1983_s29 = scalar_lea.sflag [#allocation7], %s1982_s3 }
 0x50b   : > { %p2424_p13 = pnand %p2431_p3, %p4441_p5 }
 0x50d   : > { %p2425_p8 = pneg %p2424_p13 }
 0x50f   : > { %2912 = dma.done.wait (%p2425_p8), %s1983_s29, 2048  }
 0x510   : > { %2914 = vsyncadd (%p2425_p8), %s1983_s29, 4294965248  ;;  %s1992_s22 = scalar_lea.sflag [#allocation15], %s1982_s3 }
 0x511   : > { %2916 = dma.done.wait (%p2425_p8), %s1992_s22, 4096  }
 0x512   : > { %2918 = vsyncadd (%p2425_p8), %s1992_s22, 4294963200  ;;  %s31_s8 = sadd.s32 1, %s2981_s8   ;;  %s4443_s0 = sld [smem:[#allocation22_spill]] }
 0x513   : > { %p4265_p4 = scmp.ge.s32.totalorder %s31_s8, 10   ;;  %s4444_s21 = sld [smem:[#allocation23_spill]] }
 0x514   : > { %s4445_s24 = sld [smem:[#allocation25_spill]]  ;;  %s4446_s10 = smov %s3242_s18 }
 0x515   : > { %s4447_s12 = sld [smem:[#allocation29_spill]]  ;;  %s4453_s19 = smov %s2929_s20 }
 0x516   : > { %s4448_s30 = sld [smem:[#allocation30_spill]]  ;;  %s4454_s20 = smov %s3304_s17 }
 0x517   : > { %s4449_s4 = sld [smem:[#allocation34_spill]]  ;;  %s4455_s22 = smov %s2941_s23 }
 0x518   : > { %s4450_s13 = sld [smem:[#allocation36_spill]]  ;;  %s4451_s18 = smov %s4443_s0 }
 0x519   : > { %s4456_s23 = smov %s3247_s28  ;;  %s4457_s25 = smov %s2953_s26 }
 0x51a   : > { %s4458_s26 = smov %s4446_s10  ;;  %s4460_s28 = smov %s2973_s6 }
 0x51b   : > { %s4459_s27 = smov %s4447_s12  ;;  %s4461_s29 = smov %s2977_s7 }
 0x51c   :  { %30 = sbr.rel (!%p4265_p4) target bundleno = 24 (0x18), region = 148 }
 0x51d   : > { %s4462_s6 = smov %s4449_s4 }
 0x51e   : > { %s4463_s7 = smov %s4450_s13 }
 0x521   :  { %1997 = vsyncpa [#allocation6], 1 }
 0x522   :  { %1999 = vsyncpa [#allocation6 + $0x1], 1 }
 0x523   :  { %2000 = vsyncpa [#allocation9], 1 }
 0x524   :  { %2002 = vsyncpa [#allocation9 + $0x1], 1 }
 0x525   :  { %2003 = vsyncpa [#allocation12], 1 }
 0x526   :  { %2005 = vsyncpa [#allocation12 + $0x1], 1 }
 0x527   :  { %2006 = vsyncpa [#allocation7], 1 }
 0x528   :  { %2008 = vsyncpa [#allocation7 + $0x1], 1 }
 0x529   :  { %2009 = vsyncpa [#allocation15], 1 }
 0x52a   :  { %2011 = vsyncpa [#allocation15 + $0x1], 1 }

</bundles_post_ra>
